<compile_context>
chip_gen: v6e
topology: v6e:2x2x1
jax: 0.10.0
libtpu: 0.0.40
codegen_flags: <defaults>
</compile_context>

<pallas_src>
import functools
import math

import jax
import jax.numpy as jnp
from jax import lax
from jax.experimental import pallas as pl
from jax.experimental.pallas import tpu as pltpu

# -------------------- model config (small, consistent with the module) -------
VOCAB_SIZE = 64
D_MODEL = 32          # embedding_size
CONTEXT_SIZE = 16
NUM_HEADS = 2
D_KEY = 8
D_VALUE = 8
D_FF = 64
NUM_LAYERS = 2
LN_EPS = 1e-5         # PyTorch nn.LayerNorm default

QK_W = NUM_HEADS * D_KEY            # width of the Q (and K) section of fused QKV
V_W = NUM_HEADS * D_VALUE           # width of the V section
QKV_W = 2 * QK_W + V_W              # fused QKV output width
LOGITS_W = 128                      # lane-dense (padded) logits width


# ------------------------------ in-kernel helpers ------------------------------

def _layernorm(x, g, b):
    # x: (M, D) f32; g, b: (1, D) f32
    mu = jnp.mean(x, axis=-1, keepdims=True)
    var = jnp.mean(jnp.square(x - mu), axis=-1, keepdims=True)
    return (x - mu) * lax.rsqrt(var + LN_EPS) * g + b


def _erf(x):
    # Abramowitz & Stegun 7.1.26 (max abs err 1.5e-7): exact-GELU semantics
    # using only exp / polynomial / select primitives (always lowerable).
    ax = jnp.abs(x)
    t = 1.0 / (1.0 + 0.3275911 * ax)
    poly = t * (0.254829592 + t * (-0.284496736 + t * (1.421413741
               + t * (-1.453152027 + t * 1.061405429))))
    r = 1.0 - poly * jnp.exp(-ax * ax)
    return jnp.where(x < 0, -r, r)


def _gelu_exact(x):
    # PyTorch nn.GELU() default (erf form).
    return 0.5 * x * (1.0 + _erf(x * 0.7071067811865476))


# -------------------------------- fused kernel --------------------------------

def _model_kernel(x_ref,
                  ln1g_ref, ln1b_ref, qkvw_ref, qkvb_ref, wo_ref, bo_ref,
                  ln2g_ref, ln2b_ref, w1_ref, b1_ref, w2_ref, b2_ref,
                  lnfg_ref, lnfb_ref, wout_ref, bout_ref,
                  o_ref,
                  *, num_layers, batch, seq, num_heads, d_key, d_value):
    bf16 = jnp.bfloat16
    f32 = jnp.float32

    # Residual stream lives entirely in registers (M=16, D=32).
    x = x_ref[...].astype(f32)                                       # (M, D)

    # Causal mask built ONCE (static Python layer loop below reuses the value;
    # never rebuilt per layer).
    row = lax.broadcasted_iota(jnp.int32, (seq, seq), 0)
    col = lax.broadcasted_iota(jnp.int32, (seq, seq), 1)
    causal = col <= row
    neg = jnp.float32(-1e30)

    for l in range(num_layers):                     # static unroll (L = 2)
        # ---- attention sub-block (pre-norm + residual); dropout = identity ----
        h = _layernorm(x, ln1g_ref[l], ln1b_ref[l])                   # (M, D) f32
        # 1/sqrt(d_key) is already folded into the Q columns of qkv_w/qkv_b.
        qkv = (jnp.dot(h.astype(bf16), qkvw_ref[l],
                       preferred_element_type=f32)
               + qkvb_ref[l])                                         # (M, 3*H*dh) f32

        # Per-(batch, head) causal attention on register values only: slices of
        # the `qkv` VALUE (no VMEM scratch, no masked sub-lane stores); per-head
        # outputs concatenated once before the output projection.
        rows = []
        for b in range(batch):
            r0 = b * seq
            per_head = []
            for hd in range(num_heads):
                q = qkv[r0:r0 + seq, hd * d_key:(hd + 1) * d_key]
                k = qkv[r0:r0 + seq, QK_W + hd * d_key:QK_W + (hd + 1) * d_key]
                v = qkv[r0:r0 + seq,
                        2 * QK_W + hd * d_value:2 * QK_W + (hd + 1) * d_value]
                # contract on last dims -> no explicit transpose of k.
                s = lax.dot_general(q.astype(bf16), k.astype(bf16),
                                    (((1,), (1,)), ((), ())),
                                    preferred_element_type=f32)       # (seq, seq)
                s = jnp.where(causal, s, neg)
                s = s - jnp.max(s, axis=-1, keepdims=True)
                p = jnp.exp(s)
                p = p / jnp.sum(p, axis=-1, keepdims=True)            # f32 softmax
                o = jnp.dot(p.astype(bf16), v.astype(bf16),
                            preferred_element_type=f32)               # (seq, dv)
                per_head.append(o)
            rows.append(jnp.concatenate(per_head, axis=-1))           # (seq, H*dv)
        attn = jnp.concatenate(rows, axis=0)                          # (M, H*dv)

        attn_out = (jnp.dot(attn.astype(bf16), wo_ref[l],
                            preferred_element_type=f32) + bo_ref[l])  # (M, D)
        x = x + attn_out

        # ---- MLP sub-block (pre-norm + residual) ----
        h2 = _layernorm(x, ln2g_ref[l], ln2b_ref[l])
        ff = (jnp.dot(h2.astype(bf16), w1_ref[l],
                      preferred_element_type=f32) + b1_ref[l])        # (M, D_FF)
        ff = _gelu_exact(ff)
        ff = (jnp.dot(ff.astype(bf16), w2_ref[l],
                      preferred_element_type=f32) + b2_ref[l])        # (M, D)
        x = x + ff

    # ---- final norm + lane-dense (128-wide padded) vocab projection ----
    xf = _layernorm(x, lnfg_ref[...], lnfb_ref[...])
    logits = (jnp.dot(xf.astype(bf16), wout_ref[...],
                      preferred_element_type=f32) + bout_ref[...])    # (M, 128)
    o_ref[...] = logits.astype(o_ref.dtype)                           # unmasked vst


# ----------------------------- params / forward --------------------------------

def init_params(key):
    def norm(k, shape, scale=0.02):
        return scale * jax.random.normal(k, shape, dtype=jnp.float32)

    keys = iter(jax.random.split(key, 8))
    L, D = NUM_LAYERS, D_MODEL
    scale = 1.0 / math.sqrt(D_KEY)

    # Fused [Wq | Wk | Wv]; fold the attention 1/sqrt(d_key) scale into the Q
    # columns (weight AND bias) so the kernel does no per-head scaling.
    qkv_w = norm(next(keys), (L, D, QKV_W))
    qkv_b = jnp.zeros((L, 1, QKV_W), jnp.float32)
    q_scale = jnp.concatenate([jnp.full((QK_W,), scale, jnp.float32),
                               jnp.ones((QKV_W - QK_W,), jnp.float32)])
    qkv_w = qkv_w * q_scale
    qkv_b = qkv_b * q_scale

    # Output projection padded to 128 lanes (wrapper slices back to VOCAB_SIZE).
    w_out = norm(next(keys), (D, VOCAB_SIZE))
    b_out = jnp.zeros((1, VOCAB_SIZE), jnp.float32)
    w_out_pad = jnp.pad(w_out, ((0, 0), (0, LOGITS_W - VOCAB_SIZE)))
    b_out_pad = jnp.pad(b_out, ((0, 0), (0, LOGITS_W - VOCAB_SIZE)))

    return {
        "tok_emb": norm(next(keys), (VOCAB_SIZE, D)),
        "pos_emb": norm(next(keys), (CONTEXT_SIZE, D)),
        # per-layer params stacked along a leading [NUM_LAYERS, ...] axis;
        # matmul weights in bf16 (MXU-native), biases / LN params stay f32.
        "ln1_g": jnp.ones((L, 1, D), jnp.float32),
        "ln1_b": jnp.zeros((L, 1, D), jnp.float32),
        "qkv_w": qkv_w.astype(jnp.bfloat16),
        "qkv_b": qkv_b,
        "wo": norm(next(keys), (L, V_W, D)).astype(jnp.bfloat16),
        "bo": jnp.zeros((L, 1, D), jnp.float32),
        "ln2_g": jnp.ones((L, 1, D), jnp.float32),
        "ln2_b": jnp.zeros((L, 1, D), jnp.float32),
        "w1": norm(next(keys), (L, D, D_FF)).astype(jnp.bfloat16),
        "b1": jnp.zeros((L, 1, D_FF), jnp.float32),
        "w2": norm(next(keys), (L, D_FF, D)).astype(jnp.bfloat16),
        "b2": jnp.zeros((L, 1, D), jnp.float32),
        # final norm + (lane-padded) output projection
        "lnf_g": jnp.ones((1, D), jnp.float32),
        "lnf_b": jnp.zeros((1, D), jnp.float32),
        "w_out": w_out_pad.astype(jnp.bfloat16),
        "b_out": b_out_pad,
    }


def forward(params, tokens):
    B, S = tokens.shape
    M = B * S
    D = D_MODEL

    # Embedding lookup + positional embedding (plain-JAX glue; one fused XLA op).
    x = (jnp.take(params["tok_emb"], tokens, axis=0)
         + params["pos_emb"][:S][None, :, :])
    x2d = x.reshape(M, D)

    kernel = functools.partial(
        _model_kernel,
        num_layers=NUM_LAYERS, batch=B, seq=S,
        num_heads=NUM_HEADS, d_key=D_KEY, d_value=D_VALUE)

    ordered_inputs = (
        x2d,
        params["ln1_g"], params["ln1_b"],
        params["qkv_w"], params["qkv_b"],
        params["wo"], params["bo"],
        params["ln2_g"], params["ln2_b"],
        params["w1"], params["b1"],
        params["w2"], params["b2"],
        params["lnf_g"], params["lnf_b"],
        params["w_out"], params["b_out"],
    )

    # Single grid-less invocation: every array is a whole VMEM-resident block
    # (total footprint is a few tens of KB), no per-step pipeline overhead.
    # TODO(synk): if batch grows, add a leading "parallel" grid axis over batch
    #             rows so both v7x TensorCores are used.
    logits_pad = pl.pallas_call(
        kernel,
        out_shape=jax.ShapeDtypeStruct((M, LOGITS_W), jnp.float32),
        in_specs=[pl.BlockSpec(memory_space=pltpu.MemorySpace.VMEM)
                  for _ in range(len(ordered_inputs))],
        out_specs=pl.BlockSpec(memory_space=pltpu.MemorySpace.VMEM),
    )(*ordered_inputs)

    return logits_pad[:, :VOCAB_SIZE].reshape(B, S, VOCAB_SIZE)


if __name__ == "__main__":
    key = jax.random.PRNGKey(0)
    pkey, tkey = jax.random.split(key)
    params = init_params(pkey)

    B, S = 2, 8
    tokens = jax.random.randint(tkey, (B, S), 0, VOCAB_SIZE, dtype=jnp.int32)

    logits = jax.jit(forward)(params, tokens)
    jax.block_until_ready(logits)
    assert logits.shape == (B, S, VOCAB_SIZE)
    assert logits.dtype == jnp.float32
    assert bool(jnp.all(jnp.isfinite(logits)))
    print("KERNEL_OK")
</pallas_src>

<mosaic_0001>
module attributes {stable_mosaic.version = 11 : i64} {
  func.func @_model_kernel(%arg0: memref<16x32xf32, #tpu.memory_space<vmem>>, %arg1: memref<2x1x32xf32, #tpu.memory_space<vmem>>, %arg2: memref<2x1x32xf32, #tpu.memory_space<vmem>>, %arg3: memref<2x32x48xbf16, #tpu.memory_space<vmem>>, %arg4: memref<2x1x48xf32, #tpu.memory_space<vmem>>, %arg5: memref<2x16x32xbf16, #tpu.memory_space<vmem>>, %arg6: memref<2x1x32xf32, #tpu.memory_space<vmem>>, %arg7: memref<2x1x32xf32, #tpu.memory_space<vmem>>, %arg8: memref<2x1x32xf32, #tpu.memory_space<vmem>>, %arg9: memref<2x32x64xbf16, #tpu.memory_space<vmem>>, %arg10: memref<2x1x64xf32, #tpu.memory_space<vmem>>, %arg11: memref<2x64x32xbf16, #tpu.memory_space<vmem>>, %arg12: memref<2x1x32xf32, #tpu.memory_space<vmem>>, %arg13: memref<1x32xf32, #tpu.memory_space<vmem>>, %arg14: memref<1x32xf32, #tpu.memory_space<vmem>>, %arg15: memref<32x128xbf16, #tpu.memory_space<vmem>>, %arg16: memref<1x128xf32, #tpu.memory_space<vmem>>, %arg17: memref<16x128xf32, #tpu.memory_space<vmem>>) attributes {dimension_semantics = [], scalar_prefetch = 0 : i64, scratch_operands = 0 : i64, tpu.core_type = #tpu.core_type<tc>} {
    %c0 = arith.constant 0 : index
    %c0_0 = arith.constant 0 : index
    %0 = vector.load %arg0[%c0, %c0_0] : memref<16x32xf32, #tpu.memory_space<vmem>>, vector<16x32xf32>
    %1 = tpu.iota {dimensions = array<i32: 0>} : vector<8x8xi32>
    %2 = tpu.iota {dimensions = array<i32: 1>} : vector<8x8xi32>
    %3 = arith.cmpi sle, %2, %1 : vector<8x8xi32>
    %c0_1 = arith.constant 0 : index
    %c0_2 = arith.constant 0 : index
    %c0_3 = arith.constant 0 : index
    %4 = vector.load %arg1[%c0_1, %c0_2, %c0_3] : memref<2x1x32xf32, #tpu.memory_space<vmem>>, vector<1x1x32xf32>
    %5 = vector.shape_cast %4 : vector<1x1x32xf32> to vector<1x32xf32>
    %c0_4 = arith.constant 0 : index
    %c0_5 = arith.constant 0 : index
    %c0_6 = arith.constant 0 : index
    %6 = vector.load %arg2[%c0_4, %c0_5, %c0_6] : memref<2x1x32xf32, #tpu.memory_space<vmem>>, vector<1x1x32xf32>
    %7 = vector.shape_cast %6 : vector<1x1x32xf32> to vector<1x32xf32>
    %cst = arith.constant dense<0.000000e+00> : vector<16xf32>
    %8 = vector.multi_reduction <add>, %0, %cst [1] : vector<16x32xf32> to vector<16xf32>
    %9 = vector.shape_cast %8 : vector<16xf32> to vector<16x1xf32>
    %cst_7 = arith.constant 3.200000e+01 : f32
    %10 = vector.broadcast %cst_7 : f32 to vector<16x1xf32>
    %11 = arith.divf %9, %10 : vector<16x1xf32>
    %12 = vector.broadcast %11 : vector<16x1xf32> to vector<16x32xf32>
    %13 = arith.subf %0, %12 : vector<16x32xf32>
    %14 = arith.mulf %13, %13 : vector<16x32xf32>
    %cst_8 = arith.constant dense<0.000000e+00> : vector<16xf32>
    %15 = vector.multi_reduction <add>, %14, %cst_8 [1] : vector<16x32xf32> to vector<16xf32>
    %16 = vector.shape_cast %15 : vector<16xf32> to vector<16x1xf32>
    %cst_9 = arith.constant 3.200000e+01 : f32
    %17 = vector.broadcast %cst_9 : f32 to vector<16x1xf32>
    %18 = arith.divf %16, %17 : vector<16x1xf32>
    %19 = vector.broadcast %11 : vector<16x1xf32> to vector<16x32xf32>
    %20 = arith.subf %0, %19 : vector<16x32xf32>
    %cst_10 = arith.constant 9.99999974E-6 : f32
    %21 = vector.broadcast %cst_10 : f32 to vector<16x1xf32>
    %22 = arith.addf %18, %21 : vector<16x1xf32>
    %23 = math.rsqrt %22 : vector<16x1xf32>
    %24 = vector.broadcast %23 : vector<16x1xf32> to vector<16x32xf32>
    %25 = arith.mulf %20, %24 : vector<16x32xf32>
    %26 = vector.broadcast %5 : vector<1x32xf32> to vector<16x32xf32>
    %27 = arith.mulf %25, %26 : vector<16x32xf32>
    %28 = vector.broadcast %7 : vector<1x32xf32> to vector<16x32xf32>
    %29 = arith.addf %27, %28 : vector<16x32xf32>
    %30 = arith.truncf %29 : vector<16x32xf32> to vector<16x32xbf16>
    %c0_11 = arith.constant 0 : index
    %c0_12 = arith.constant 0 : index
    %c0_13 = arith.constant 0 : index
    %31 = vector.load %arg3[%c0_11, %c0_12, %c0_13] : memref<2x32x48xbf16, #tpu.memory_space<vmem>>, vector<1x32x48xbf16>
    %32 = vector.shape_cast %31 : vector<1x32x48xbf16> to vector<32x48xbf16>
    %cst_14 = arith.constant dense<0.000000e+00> : vector<16x48xf32>
    %33 = tpu.matmul %30, %32, %cst_14 {dimension_numbers = #tpu.dot_dimension_numbers<[1], [0], [0], [1], [0, 0, 1, 1], [], []>} : vector<16x32xbf16>, vector<32x48xbf16>, vector<16x48xf32> -> vector<16x48xf32>
    %c0_15 = arith.constant 0 : index
    %c0_16 = arith.constant 0 : index
    %c0_17 = arith.constant 0 : index
    %34 = vector.load %arg4[%c0_15, %c0_16, %c0_17] : memref<2x1x48xf32, #tpu.memory_space<vmem>>, vector<1x1x48xf32>
    %35 = vector.shape_cast %34 : vector<1x1x48xf32> to vector<1x48xf32>
    %36 = vector.broadcast %35 : vector<1x48xf32> to vector<16x48xf32>
    %37 = arith.addf %33, %36 : vector<16x48xf32>
    %38 = vector.extract_strided_slice %37 {offsets = [0, 0], sizes = [8, 8], strides = [1, 1]} : vector<16x48xf32> to vector<8x8xf32>
    %39 = vector.extract_strided_slice %37 {offsets = [0, 16], sizes = [8, 8], strides = [1, 1]} : vector<16x48xf32> to vector<8x8xf32>
    %40 = vector.extract_strided_slice %37 {offsets = [0, 32], sizes = [8, 8], strides = [1, 1]} : vector<16x48xf32> to vector<8x8xf32>
    %41 = arith.truncf %38 : vector<8x8xf32> to vector<8x8xbf16>
    %42 = arith.truncf %39 : vector<8x8xf32> to vector<8x8xbf16>
    %cst_18 = arith.constant dense<0.000000e+00> : vector<8x8xf32>
    %43 = tpu.matmul %41, %42, %cst_18 {dimension_numbers = #tpu.dot_dimension_numbers<[1], [1], [0], [0], [0, 0, 1, 0], [], []>} : vector<8x8xbf16>, vector<8x8xbf16>, vector<8x8xf32> -> vector<8x8xf32>
    %cst_19 = arith.constant -1.000000e+30 : f32
    %44 = vector.broadcast %cst_19 : f32 to vector<8x8xf32>
    %45 = arith.select %3, %43, %44 : vector<8x8xi1>, vector<8x8xf32>
    %cst_20 = arith.constant dense<0xFF800000> : vector<8xf32>
    %46 = vector.multi_reduction <maximumf>, %45, %cst_20 [1] : vector<8x8xf32> to vector<8xf32>
    %47 = vector.shape_cast %46 : vector<8xf32> to vector<8x1xf32>
    %48 = vector.broadcast %47 : vector<8x1xf32> to vector<8x8xf32>
    %49 = arith.subf %45, %48 : vector<8x8xf32>
    %50 = math.exp %49 : vector<8x8xf32>
    %cst_21 = arith.constant dense<0.000000e+00> : vector<8xf32>
    %51 = vector.multi_reduction <add>, %50, %cst_21 [1] : vector<8x8xf32> to vector<8xf32>
    %52 = vector.shape_cast %51 : vector<8xf32> to vector<8x1xf32>
    %53 = vector.broadcast %52 : vector<8x1xf32> to vector<8x8xf32>
    %54 = arith.divf %50, %53 : vector<8x8xf32>
    %55 = arith.truncf %54 : vector<8x8xf32> to vector<8x8xbf16>
    %56 = arith.truncf %40 : vector<8x8xf32> to vector<8x8xbf16>
    %cst_22 = arith.constant dense<0.000000e+00> : vector<8x8xf32>
    %57 = tpu.matmul %55, %56, %cst_22 {dimension_numbers = #tpu.dot_dimension_numbers<[1], [0], [0], [1], [0, 0, 1, 1], [], []>} : vector<8x8xbf16>, vector<8x8xbf16>, vector<8x8xf32> -> vector<8x8xf32>
    %58 = vector.extract_strided_slice %37 {offsets = [0, 8], sizes = [8, 8], strides = [1, 1]} : vector<16x48xf32> to vector<8x8xf32>
    %59 = vector.extract_strided_slice %37 {offsets = [0, 24], sizes = [8, 8], strides = [1, 1]} : vector<16x48xf32> to vector<8x8xf32>
    %60 = vector.extract_strided_slice %37 {offsets = [0, 40], sizes = [8, 8], strides = [1, 1]} : vector<16x48xf32> to vector<8x8xf32>
    %61 = arith.truncf %58 : vector<8x8xf32> to vector<8x8xbf16>
    %62 = arith.truncf %59 : vector<8x8xf32> to vector<8x8xbf16>
    %cst_23 = arith.constant dense<0.000000e+00> : vector<8x8xf32>
    %63 = tpu.matmul %61, %62, %cst_23 {dimension_numbers = #tpu.dot_dimension_numbers<[1], [1], [0], [0], [0, 0, 1, 0], [], []>} : vector<8x8xbf16>, vector<8x8xbf16>, vector<8x8xf32> -> vector<8x8xf32>
    %cst_24 = arith.constant -1.000000e+30 : f32
    %64 = vector.broadcast %cst_24 : f32 to vector<8x8xf32>
    %65 = arith.select %3, %63, %64 : vector<8x8xi1>, vector<8x8xf32>
    %cst_25 = arith.constant dense<0xFF800000> : vector<8xf32>
    %66 = vector.multi_reduction <maximumf>, %65, %cst_25 [1] : vector<8x8xf32> to vector<8xf32>
    %67 = vector.shape_cast %66 : vector<8xf32> to vector<8x1xf32>
    %68 = vector.broadcast %67 : vector<8x1xf32> to vector<8x8xf32>
    %69 = arith.subf %65, %68 : vector<8x8xf32>
    %70 = math.exp %69 : vector<8x8xf32>
    %cst_26 = arith.constant dense<0.000000e+00> : vector<8xf32>
    %71 = vector.multi_reduction <add>, %70, %cst_26 [1] : vector<8x8xf32> to vector<8xf32>
    %72 = vector.shape_cast %71 : vector<8xf32> to vector<8x1xf32>
    %73 = vector.broadcast %72 : vector<8x1xf32> to vector<8x8xf32>
    %74 = arith.divf %70, %73 : vector<8x8xf32>
    %75 = arith.truncf %74 : vector<8x8xf32> to vector<8x8xbf16>
    %76 = arith.truncf %60 : vector<8x8xf32> to vector<8x8xbf16>
    %cst_27 = arith.constant dense<0.000000e+00> : vector<8x8xf32>
    %77 = tpu.matmul %75, %76, %cst_27 {dimension_numbers = #tpu.dot_dimension_numbers<[1], [0], [0], [1], [0, 0, 1, 1], [], []>} : vector<8x8xbf16>, vector<8x8xbf16>, vector<8x8xf32> -> vector<8x8xf32>
    %78 = tpu.concatenate %57, %77 in 1 : vector<8x8xf32>, vector<8x8xf32> -> vector<8x16xf32>
    %79 = vector.extract_strided_slice %37 {offsets = [8, 0], sizes = [8, 8], strides = [1, 1]} : vector<16x48xf32> to vector<8x8xf32>
    %80 = vector.extract_strided_slice %37 {offsets = [8, 16], sizes = [8, 8], strides = [1, 1]} : vector<16x48xf32> to vector<8x8xf32>
    %81 = vector.extract_strided_slice %37 {offsets = [8, 32], sizes = [8, 8], strides = [1, 1]} : vector<16x48xf32> to vector<8x8xf32>
    %82 = arith.truncf %79 : vector<8x8xf32> to vector<8x8xbf16>
    %83 = arith.truncf %80 : vector<8x8xf32> to vector<8x8xbf16>
    %cst_28 = arith.constant dense<0.000000e+00> : vector<8x8xf32>
    %84 = tpu.matmul %82, %83, %cst_28 {dimension_numbers = #tpu.dot_dimension_numbers<[1], [1], [0], [0], [0, 0, 1, 0], [], []>} : vector<8x8xbf16>, vector<8x8xbf16>, vector<8x8xf32> -> vector<8x8xf32>
    %cst_29 = arith.constant -1.000000e+30 : f32
    %85 = vector.broadcast %cst_29 : f32 to vector<8x8xf32>
    %86 = arith.select %3, %84, %85 : vector<8x8xi1>, vector<8x8xf32>
    %cst_30 = arith.constant dense<0xFF800000> : vector<8xf32>
    %87 = vector.multi_reduction <maximumf>, %86, %cst_30 [1] : vector<8x8xf32> to vector<8xf32>
    %88 = vector.shape_cast %87 : vector<8xf32> to vector<8x1xf32>
    %89 = vector.broadcast %88 : vector<8x1xf32> to vector<8x8xf32>
    %90 = arith.subf %86, %89 : vector<8x8xf32>
    %91 = math.exp %90 : vector<8x8xf32>
    %cst_31 = arith.constant dense<0.000000e+00> : vector<8xf32>
    %92 = vector.multi_reduction <add>, %91, %cst_31 [1] : vector<8x8xf32> to vector<8xf32>
    %93 = vector.shape_cast %92 : vector<8xf32> to vector<8x1xf32>
    %94 = vector.broadcast %93 : vector<8x1xf32> to vector<8x8xf32>
    %95 = arith.divf %91, %94 : vector<8x8xf32>
    %96 = arith.truncf %95 : vector<8x8xf32> to vector<8x8xbf16>
    %97 = arith.truncf %81 : vector<8x8xf32> to vector<8x8xbf16>
    %cst_32 = arith.constant dense<0.000000e+00> : vector<8x8xf32>
    %98 = tpu.matmul %96, %97, %cst_32 {dimension_numbers = #tpu.dot_dimension_numbers<[1], [0], [0], [1], [0, 0, 1, 1], [], []>} : vector<8x8xbf16>, vector<8x8xbf16>, vector<8x8xf32> -> vector<8x8xf32>
    %99 = vector.extract_strided_slice %37 {offsets = [8, 8], sizes = [8, 8], strides = [1, 1]} : vector<16x48xf32> to vector<8x8xf32>
    %100 = vector.extract_strided_slice %37 {offsets = [8, 24], sizes = [8, 8], strides = [1, 1]} : vector<16x48xf32> to vector<8x8xf32>
    %101 = vector.extract_strided_slice %37 {offsets = [8, 40], sizes = [8, 8], strides = [1, 1]} : vector<16x48xf32> to vector<8x8xf32>
    %102 = arith.truncf %99 : vector<8x8xf32> to vector<8x8xbf16>
    %103 = arith.truncf %100 : vector<8x8xf32> to vector<8x8xbf16>
    %cst_33 = arith.constant dense<0.000000e+00> : vector<8x8xf32>
    %104 = tpu.matmul %102, %103, %cst_33 {dimension_numbers = #tpu.dot_dimension_numbers<[1], [1], [0], [0], [0, 0, 1, 0], [], []>} : vector<8x8xbf16>, vector<8x8xbf16>, vector<8x8xf32> -> vector<8x8xf32>
    %cst_34 = arith.constant -1.000000e+30 : f32
    %105 = vector.broadcast %cst_34 : f32 to vector<8x8xf32>
    %106 = arith.select %3, %104, %105 : vector<8x8xi1>, vector<8x8xf32>
    %cst_35 = arith.constant dense<0xFF800000> : vector<8xf32>
    %107 = vector.multi_reduction <maximumf>, %106, %cst_35 [1] : vector<8x8xf32> to vector<8xf32>
    %108 = vector.shape_cast %107 : vector<8xf32> to vector<8x1xf32>
    %109 = vector.broadcast %108 : vector<8x1xf32> to vector<8x8xf32>
    %110 = arith.subf %106, %109 : vector<8x8xf32>
    %111 = math.exp %110 : vector<8x8xf32>
    %cst_36 = arith.constant dense<0.000000e+00> : vector<8xf32>
    %112 = vector.multi_reduction <add>, %111, %cst_36 [1] : vector<8x8xf32> to vector<8xf32>
    %113 = vector.shape_cast %112 : vector<8xf32> to vector<8x1xf32>
    %114 = vector.broadcast %113 : vector<8x1xf32> to vector<8x8xf32>
    %115 = arith.divf %111, %114 : vector<8x8xf32>
    %116 = arith.truncf %115 : vector<8x8xf32> to vector<8x8xbf16>
    %117 = arith.truncf %101 : vector<8x8xf32> to vector<8x8xbf16>
    %cst_37 = arith.constant dense<0.000000e+00> : vector<8x8xf32>
    %118 = tpu.matmul %116, %117, %cst_37 {dimension_numbers = #tpu.dot_dimension_numbers<[1], [0], [0], [1], [0, 0, 1, 1], [], []>} : vector<8x8xbf16>, vector<8x8xbf16>, vector<8x8xf32> -> vector<8x8xf32>
    %119 = tpu.concatenate %98, %118 in 1 : vector<8x8xf32>, vector<8x8xf32> -> vector<8x16xf32>
    %120 = tpu.concatenate %78, %119 in 0 : vector<8x16xf32>, vector<8x16xf32> -> vector<16x16xf32>
    %121 = arith.truncf %120 : vector<16x16xf32> to vector<16x16xbf16>
    %c0_38 = arith.constant 0 : index
    %c0_39 = arith.constant 0 : index
    %c0_40 = arith.constant 0 : index
    %122 = vector.load %arg5[%c0_38, %c0_39, %c0_40] : memref<2x16x32xbf16, #tpu.memory_space<vmem>>, vector<1x16x32xbf16>
    %123 = vector.shape_cast %122 : vector<1x16x32xbf16> to vector<16x32xbf16>
    %cst_41 = arith.constant dense<0.000000e+00> : vector<16x32xf32>
    %124 = tpu.matmul %121, %123, %cst_41 {dimension_numbers = #tpu.dot_dimension_numbers<[1], [0], [0], [1], [0, 0, 1, 1], [], []>} : vector<16x16xbf16>, vector<16x32xbf16>, vector<16x32xf32> -> vector<16x32xf32>
    %c0_42 = arith.constant 0 : index
    %c0_43 = arith.constant 0 : index
    %c0_44 = arith.constant 0 : index
    %125 = vector.load %arg6[%c0_42, %c0_43, %c0_44] : memref<2x1x32xf32, #tpu.memory_space<vmem>>, vector<1x1x32xf32>
    %126 = vector.shape_cast %125 : vector<1x1x32xf32> to vector<1x32xf32>
    %127 = vector.broadcast %126 : vector<1x32xf32> to vector<16x32xf32>
    %128 = arith.addf %124, %127 : vector<16x32xf32>
    %129 = arith.addf %0, %128 : vector<16x32xf32>
    %c0_45 = arith.constant 0 : index
    %c0_46 = arith.constant 0 : index
    %c0_47 = arith.constant 0 : index
    %130 = vector.load %arg7[%c0_45, %c0_46, %c0_47] : memref<2x1x32xf32, #tpu.memory_space<vmem>>, vector<1x1x32xf32>
    %131 = vector.shape_cast %130 : vector<1x1x32xf32> to vector<1x32xf32>
    %c0_48 = arith.constant 0 : index
    %c0_49 = arith.constant 0 : index
    %c0_50 = arith.constant 0 : index
    %132 = vector.load %arg8[%c0_48, %c0_49, %c0_50] : memref<2x1x32xf32, #tpu.memory_space<vmem>>, vector<1x1x32xf32>
    %133 = vector.shape_cast %132 : vector<1x1x32xf32> to vector<1x32xf32>
    %cst_51 = arith.constant dense<0.000000e+00> : vector<16xf32>
    %134 = vector.multi_reduction <add>, %129, %cst_51 [1] : vector<16x32xf32> to vector<16xf32>
    %135 = vector.shape_cast %134 : vector<16xf32> to vector<16x1xf32>
    %cst_52 = arith.constant 3.200000e+01 : f32
    %136 = vector.broadcast %cst_52 : f32 to vector<16x1xf32>
    %137 = arith.divf %135, %136 : vector<16x1xf32>
    %138 = vector.broadcast %137 : vector<16x1xf32> to vector<16x32xf32>
    %139 = arith.subf %129, %138 : vector<16x32xf32>
    %140 = arith.mulf %139, %139 : vector<16x32xf32>
    %cst_53 = arith.constant dense<0.000000e+00> : vector<16xf32>
    %141 = vector.multi_reduction <add>, %140, %cst_53 [1] : vector<16x32xf32> to vector<16xf32>
    %142 = vector.shape_cast %141 : vector<16xf32> to vector<16x1xf32>
    %cst_54 = arith.constant 3.200000e+01 : f32
    %143 = vector.broadcast %cst_54 : f32 to vector<16x1xf32>
    %144 = arith.divf %142, %143 : vector<16x1xf32>
    %145 = vector.broadcast %137 : vector<16x1xf32> to vector<16x32xf32>
    %146 = arith.subf %129, %145 : vector<16x32xf32>
    %cst_55 = arith.constant 9.99999974E-6 : f32
    %147 = vector.broadcast %cst_55 : f32 to vector<16x1xf32>
    %148 = arith.addf %144, %147 : vector<16x1xf32>
    %149 = math.rsqrt %148 : vector<16x1xf32>
    %150 = vector.broadcast %149 : vector<16x1xf32> to vector<16x32xf32>
    %151 = arith.mulf %146, %150 : vector<16x32xf32>
    %152 = vector.broadcast %131 : vector<1x32xf32> to vector<16x32xf32>
    %153 = arith.mulf %151, %152 : vector<16x32xf32>
    %154 = vector.broadcast %133 : vector<1x32xf32> to vector<16x32xf32>
    %155 = arith.addf %153, %154 : vector<16x32xf32>
    %156 = arith.truncf %155 : vector<16x32xf32> to vector<16x32xbf16>
    %c0_56 = arith.constant 0 : index
    %c0_57 = arith.constant 0 : index
    %c0_58 = arith.constant 0 : index
    %157 = vector.load %arg9[%c0_56, %c0_57, %c0_58] : memref<2x32x64xbf16, #tpu.memory_space<vmem>>, vector<1x32x64xbf16>
    %158 = vector.shape_cast %157 : vector<1x32x64xbf16> to vector<32x64xbf16>
    %cst_59 = arith.constant dense<0.000000e+00> : vector<16x64xf32>
    %159 = tpu.matmul %156, %158, %cst_59 {dimension_numbers = #tpu.dot_dimension_numbers<[1], [0], [0], [1], [0, 0, 1, 1], [], []>} : vector<16x32xbf16>, vector<32x64xbf16>, vector<16x64xf32> -> vector<16x64xf32>
    %c0_60 = arith.constant 0 : index
    %c0_61 = arith.constant 0 : index
    %c0_62 = arith.constant 0 : index
    %160 = vector.load %arg10[%c0_60, %c0_61, %c0_62] : memref<2x1x64xf32, #tpu.memory_space<vmem>>, vector<1x1x64xf32>
    %161 = vector.shape_cast %160 : vector<1x1x64xf32> to vector<1x64xf32>
    %162 = vector.broadcast %161 : vector<1x64xf32> to vector<16x64xf32>
    %163 = arith.addf %159, %162 : vector<16x64xf32>
    %cst_63 = arith.constant 5.000000e-01 : f32
    %164 = vector.broadcast %cst_63 : f32 to vector<16x64xf32>
    %165 = arith.mulf %164, %163 : vector<16x64xf32>
    %cst_64 = arith.constant 0.707106769 : f32
    %166 = vector.broadcast %cst_64 : f32 to vector<16x64xf32>
    %167 = arith.mulf %163, %166 : vector<16x64xf32>
    %168 = math.absf %167 : vector<16x64xf32>
    %cst_65 = arith.constant 0.327591091 : f32
    %169 = vector.broadcast %cst_65 : f32 to vector<16x64xf32>
    %170 = arith.mulf %169, %168 : vector<16x64xf32>
    %cst_66 = arith.constant 1.000000e+00 : f32
    %171 = vector.broadcast %cst_66 : f32 to vector<16x64xf32>
    %172 = arith.addf %171, %170 : vector<16x64xf32>
    %cst_67 = arith.constant 1.000000e+00 : f32
    %173 = vector.broadcast %cst_67 : f32 to vector<16x64xf32>
    %174 = arith.divf %173, %172 : vector<16x64xf32>
    %cst_68 = arith.constant 1.06140542 : f32
    %175 = vector.broadcast %cst_68 : f32 to vector<16x64xf32>
    %176 = arith.mulf %174, %175 : vector<16x64xf32>
    %cst_69 = arith.constant -1.45315206 : f32
    %177 = vector.broadcast %cst_69 : f32 to vector<16x64xf32>
    %178 = arith.addf %177, %176 : vector<16x64xf32>
    %179 = arith.mulf %174, %178 : vector<16x64xf32>
    %cst_70 = arith.constant 1.42141378 : f32
    %180 = vector.broadcast %cst_70 : f32 to vector<16x64xf32>
    %181 = arith.addf %180, %179 : vector<16x64xf32>
    %182 = arith.mulf %174, %181 : vector<16x64xf32>
    %cst_71 = arith.constant -0.284496725 : f32
    %183 = vector.broadcast %cst_71 : f32 to vector<16x64xf32>
    %184 = arith.addf %183, %182 : vector<16x64xf32>
    %185 = arith.mulf %174, %184 : vector<16x64xf32>
    %cst_72 = arith.constant 0.254829586 : f32
    %186 = vector.broadcast %cst_72 : f32 to vector<16x64xf32>
    %187 = arith.addf %186, %185 : vector<16x64xf32>
    %188 = arith.mulf %174, %187 : vector<16x64xf32>
    %cst_73 = arith.constant 0.000000e+00 : f32
    %189 = vector.broadcast %cst_73 : f32 to vector<16x64xf32>
    %190 = arith.subf %189, %168 : vector<16x64xf32>
    %191 = arith.mulf %190, %168 : vector<16x64xf32>
    %192 = math.exp %191 : vector<16x64xf32>
    %193 = arith.mulf %188, %192 : vector<16x64xf32>
    %cst_74 = arith.constant 1.000000e+00 : f32
    %194 = vector.broadcast %cst_74 : f32 to vector<16x64xf32>
    %195 = arith.subf %194, %193 : vector<16x64xf32>
    %cst_75 = arith.constant 0.000000e+00 : f32
    %196 = vector.broadcast %cst_75 : f32 to vector<16x64xf32>
    %197 = arith.cmpf olt, %167, %196 : vector<16x64xf32>
    %cst_76 = arith.constant 0.000000e+00 : f32
    %198 = vector.broadcast %cst_76 : f32 to vector<16x64xf32>
    %199 = arith.subf %198, %195 : vector<16x64xf32>
    %200 = arith.select %197, %199, %195 : vector<16x64xi1>, vector<16x64xf32>
    %cst_77 = arith.constant 1.000000e+00 : f32
    %201 = vector.broadcast %cst_77 : f32 to vector<16x64xf32>
    %202 = arith.addf %201, %200 : vector<16x64xf32>
    %203 = arith.mulf %165, %202 : vector<16x64xf32>
    %204 = arith.truncf %203 : vector<16x64xf32> to vector<16x64xbf16>
    %c0_78 = arith.constant 0 : index
    %c0_79 = arith.constant 0 : index
    %c0_80 = arith.constant 0 : index
    %205 = vector.load %arg11[%c0_78, %c0_79, %c0_80] : memref<2x64x32xbf16, #tpu.memory_space<vmem>>, vector<1x64x32xbf16>
    %206 = vector.shape_cast %205 : vector<1x64x32xbf16> to vector<64x32xbf16>
    %cst_81 = arith.constant dense<0.000000e+00> : vector<16x32xf32>
    %207 = tpu.matmul %204, %206, %cst_81 {dimension_numbers = #tpu.dot_dimension_numbers<[1], [0], [0], [1], [0, 0, 1, 1], [], []>} : vector<16x64xbf16>, vector<64x32xbf16>, vector<16x32xf32> -> vector<16x32xf32>
    %c0_82 = arith.constant 0 : index
    %c0_83 = arith.constant 0 : index
    %c0_84 = arith.constant 0 : index
    %208 = vector.load %arg12[%c0_82, %c0_83, %c0_84] : memref<2x1x32xf32, #tpu.memory_space<vmem>>, vector<1x1x32xf32>
    %209 = vector.shape_cast %208 : vector<1x1x32xf32> to vector<1x32xf32>
    %210 = vector.broadcast %209 : vector<1x32xf32> to vector<16x32xf32>
    %211 = arith.addf %207, %210 : vector<16x32xf32>
    %212 = arith.addf %129, %211 : vector<16x32xf32>
    %c1 = arith.constant 1 : index
    %c0_85 = arith.constant 0 : index
    %c0_86 = arith.constant 0 : index
    %213 = vector.load %arg1[%c1, %c0_85, %c0_86] : memref<2x1x32xf32, #tpu.memory_space<vmem>>, vector<1x1x32xf32>
    %214 = vector.shape_cast %213 : vector<1x1x32xf32> to vector<1x32xf32>
    %c1_87 = arith.constant 1 : index
    %c0_88 = arith.constant 0 : index
    %c0_89 = arith.constant 0 : index
    %215 = vector.load %arg2[%c1_87, %c0_88, %c0_89] : memref<2x1x32xf32, #tpu.memory_space<vmem>>, vector<1x1x32xf32>
    %216 = vector.shape_cast %215 : vector<1x1x32xf32> to vector<1x32xf32>
    %cst_90 = arith.constant dense<0.000000e+00> : vector<16xf32>
    %217 = vector.multi_reduction <add>, %212, %cst_90 [1] : vector<16x32xf32> to vector<16xf32>
    %218 = vector.shape_cast %217 : vector<16xf32> to vector<16x1xf32>
    %cst_91 = arith.constant 3.200000e+01 : f32
    %219 = vector.broadcast %cst_91 : f32 to vector<16x1xf32>
    %220 = arith.divf %218, %219 : vector<16x1xf32>
    %221 = vector.broadcast %220 : vector<16x1xf32> to vector<16x32xf32>
    %222 = arith.subf %212, %221 : vector<16x32xf32>
    %223 = arith.mulf %222, %222 : vector<16x32xf32>
    %cst_92 = arith.constant dense<0.000000e+00> : vector<16xf32>
    %224 = vector.multi_reduction <add>, %223, %cst_92 [1] : vector<16x32xf32> to vector<16xf32>
    %225 = vector.shape_cast %224 : vector<16xf32> to vector<16x1xf32>
    %cst_93 = arith.constant 3.200000e+01 : f32
    %226 = vector.broadcast %cst_93 : f32 to vector<16x1xf32>
    %227 = arith.divf %225, %226 : vector<16x1xf32>
    %228 = vector.broadcast %220 : vector<16x1xf32> to vector<16x32xf32>
    %229 = arith.subf %212, %228 : vector<16x32xf32>
    %cst_94 = arith.constant 9.99999974E-6 : f32
    %230 = vector.broadcast %cst_94 : f32 to vector<16x1xf32>
    %231 = arith.addf %227, %230 : vector<16x1xf32>
    %232 = math.rsqrt %231 : vector<16x1xf32>
    %233 = vector.broadcast %232 : vector<16x1xf32> to vector<16x32xf32>
    %234 = arith.mulf %229, %233 : vector<16x32xf32>
    %235 = vector.broadcast %214 : vector<1x32xf32> to vector<16x32xf32>
    %236 = arith.mulf %234, %235 : vector<16x32xf32>
    %237 = vector.broadcast %216 : vector<1x32xf32> to vector<16x32xf32>
    %238 = arith.addf %236, %237 : vector<16x32xf32>
    %239 = arith.truncf %238 : vector<16x32xf32> to vector<16x32xbf16>
    %c1_95 = arith.constant 1 : index
    %c0_96 = arith.constant 0 : index
    %c0_97 = arith.constant 0 : index
    %240 = vector.load %arg3[%c1_95, %c0_96, %c0_97] : memref<2x32x48xbf16, #tpu.memory_space<vmem>>, vector<1x32x48xbf16>
    %241 = vector.shape_cast %240 : vector<1x32x48xbf16> to vector<32x48xbf16>
    %cst_98 = arith.constant dense<0.000000e+00> : vector<16x48xf32>
    %242 = tpu.matmul %239, %241, %cst_98 {dimension_numbers = #tpu.dot_dimension_numbers<[1], [0], [0], [1], [0, 0, 1, 1], [], []>} : vector<16x32xbf16>, vector<32x48xbf16>, vector<16x48xf32> -> vector<16x48xf32>
    %c1_99 = arith.constant 1 : index
    %c0_100 = arith.constant 0 : index
    %c0_101 = arith.constant 0 : index
    %243 = vector.load %arg4[%c1_99, %c0_100, %c0_101] : memref<2x1x48xf32, #tpu.memory_space<vmem>>, vector<1x1x48xf32>
    %244 = vector.shape_cast %243 : vector<1x1x48xf32> to vector<1x48xf32>
    %245 = vector.broadcast %244 : vector<1x48xf32> to vector<16x48xf32>
    %246 = arith.addf %242, %245 : vector<16x48xf32>
    %247 = vector.extract_strided_slice %246 {offsets = [0, 0], sizes = [8, 8], strides = [1, 1]} : vector<16x48xf32> to vector<8x8xf32>
    %248 = vector.extract_strided_slice %246 {offsets = [0, 16], sizes = [8, 8], strides = [1, 1]} : vector<16x48xf32> to vector<8x8xf32>
    %249 = vector.extract_strided_slice %246 {offsets = [0, 32], sizes = [8, 8], strides = [1, 1]} : vector<16x48xf32> to vector<8x8xf32>
    %250 = arith.truncf %247 : vector<8x8xf32> to vector<8x8xbf16>
    %251 = arith.truncf %248 : vector<8x8xf32> to vector<8x8xbf16>
    %cst_102 = arith.constant dense<0.000000e+00> : vector<8x8xf32>
    %252 = tpu.matmul %250, %251, %cst_102 {dimension_numbers = #tpu.dot_dimension_numbers<[1], [1], [0], [0], [0, 0, 1, 0], [], []>} : vector<8x8xbf16>, vector<8x8xbf16>, vector<8x8xf32> -> vector<8x8xf32>
    %cst_103 = arith.constant -1.000000e+30 : f32
    %253 = vector.broadcast %cst_103 : f32 to vector<8x8xf32>
    %254 = arith.select %3, %252, %253 : vector<8x8xi1>, vector<8x8xf32>
    %cst_104 = arith.constant dense<0xFF800000> : vector<8xf32>
    %255 = vector.multi_reduction <maximumf>, %254, %cst_104 [1] : vector<8x8xf32> to vector<8xf32>
    %256 = vector.shape_cast %255 : vector<8xf32> to vector<8x1xf32>
    %257 = vector.broadcast %256 : vector<8x1xf32> to vector<8x8xf32>
    %258 = arith.subf %254, %257 : vector<8x8xf32>
    %259 = math.exp %258 : vector<8x8xf32>
    %cst_105 = arith.constant dense<0.000000e+00> : vector<8xf32>
    %260 = vector.multi_reduction <add>, %259, %cst_105 [1] : vector<8x8xf32> to vector<8xf32>
    %261 = vector.shape_cast %260 : vector<8xf32> to vector<8x1xf32>
    %262 = vector.broadcast %261 : vector<8x1xf32> to vector<8x8xf32>
    %263 = arith.divf %259, %262 : vector<8x8xf32>
    %264 = arith.truncf %263 : vector<8x8xf32> to vector<8x8xbf16>
    %265 = arith.truncf %249 : vector<8x8xf32> to vector<8x8xbf16>
    %cst_106 = arith.constant dense<0.000000e+00> : vector<8x8xf32>
    %266 = tpu.matmul %264, %265, %cst_106 {dimension_numbers = #tpu.dot_dimension_numbers<[1], [0], [0], [1], [0, 0, 1, 1], [], []>} : vector<8x8xbf16>, vector<8x8xbf16>, vector<8x8xf32> -> vector<8x8xf32>
    %267 = vector.extract_strided_slice %246 {offsets = [0, 8], sizes = [8, 8], strides = [1, 1]} : vector<16x48xf32> to vector<8x8xf32>
    %268 = vector.extract_strided_slice %246 {offsets = [0, 24], sizes = [8, 8], strides = [1, 1]} : vector<16x48xf32> to vector<8x8xf32>
    %269 = vector.extract_strided_slice %246 {offsets = [0, 40], sizes = [8, 8], strides = [1, 1]} : vector<16x48xf32> to vector<8x8xf32>
    %270 = arith.truncf %267 : vector<8x8xf32> to vector<8x8xbf16>
    %271 = arith.truncf %268 : vector<8x8xf32> to vector<8x8xbf16>
    %cst_107 = arith.constant dense<0.000000e+00> : vector<8x8xf32>
    %272 = tpu.matmul %270, %271, %cst_107 {dimension_numbers = #tpu.dot_dimension_numbers<[1], [1], [0], [0], [0, 0, 1, 0], [], []>} : vector<8x8xbf16>, vector<8x8xbf16>, vector<8x8xf32> -> vector<8x8xf32>
    %cst_108 = arith.constant -1.000000e+30 : f32
    %273 = vector.broadcast %cst_108 : f32 to vector<8x8xf32>
    %274 = arith.select %3, %272, %273 : vector<8x8xi1>, vector<8x8xf32>
    %cst_109 = arith.constant dense<0xFF800000> : vector<8xf32>
    %275 = vector.multi_reduction <maximumf>, %274, %cst_109 [1] : vector<8x8xf32> to vector<8xf32>
    %276 = vector.shape_cast %275 : vector<8xf32> to vector<8x1xf32>
    %277 = vector.broadcast %276 : vector<8x1xf32> to vector<8x8xf32>
    %278 = arith.subf %274, %277 : vector<8x8xf32>
    %279 = math.exp %278 : vector<8x8xf32>
    %cst_110 = arith.constant dense<0.000000e+00> : vector<8xf32>
    %280 = vector.multi_reduction <add>, %279, %cst_110 [1] : vector<8x8xf32> to vector<8xf32>
    %281 = vector.shape_cast %280 : vector<8xf32> to vector<8x1xf32>
    %282 = vector.broadcast %281 : vector<8x1xf32> to vector<8x8xf32>
    %283 = arith.divf %279, %282 : vector<8x8xf32>
    %284 = arith.truncf %283 : vector<8x8xf32> to vector<8x8xbf16>
    %285 = arith.truncf %269 : vector<8x8xf32> to vector<8x8xbf16>
    %cst_111 = arith.constant dense<0.000000e+00> : vector<8x8xf32>
    %286 = tpu.matmul %284, %285, %cst_111 {dimension_numbers = #tpu.dot_dimension_numbers<[1], [0], [0], [1], [0, 0, 1, 1], [], []>} : vector<8x8xbf16>, vector<8x8xbf16>, vector<8x8xf32> -> vector<8x8xf32>
    %287 = tpu.concatenate %266, %286 in 1 : vector<8x8xf32>, vector<8x8xf32> -> vector<8x16xf32>
    %288 = vector.extract_strided_slice %246 {offsets = [8, 0], sizes = [8, 8], strides = [1, 1]} : vector<16x48xf32> to vector<8x8xf32>
    %289 = vector.extract_strided_slice %246 {offsets = [8, 16], sizes = [8, 8], strides = [1, 1]} : vector<16x48xf32> to vector<8x8xf32>
    %290 = vector.extract_strided_slice %246 {offsets = [8, 32], sizes = [8, 8], strides = [1, 1]} : vector<16x48xf32> to vector<8x8xf32>
    %291 = arith.truncf %288 : vector<8x8xf32> to vector<8x8xbf16>
    %292 = arith.truncf %289 : vector<8x8xf32> to vector<8x8xbf16>
    %cst_112 = arith.constant dense<0.000000e+00> : vector<8x8xf32>
    %293 = tpu.matmul %291, %292, %cst_112 {dimension_numbers = #tpu.dot_dimension_numbers<[1], [1], [0], [0], [0, 0, 1, 0], [], []>} : vector<8x8xbf16>, vector<8x8xbf16>, vector<8x8xf32> -> vector<8x8xf32>
    %cst_113 = arith.constant -1.000000e+30 : f32
    %294 = vector.broadcast %cst_113 : f32 to vector<8x8xf32>
    %295 = arith.select %3, %293, %294 : vector<8x8xi1>, vector<8x8xf32>
    %cst_114 = arith.constant dense<0xFF800000> : vector<8xf32>
    %296 = vector.multi_reduction <maximumf>, %295, %cst_114 [1] : vector<8x8xf32> to vector<8xf32>
    %297 = vector.shape_cast %296 : vector<8xf32> to vector<8x1xf32>
    %298 = vector.broadcast %297 : vector<8x1xf32> to vector<8x8xf32>
    %299 = arith.subf %295, %298 : vector<8x8xf32>
    %300 = math.exp %299 : vector<8x8xf32>
    %cst_115 = arith.constant dense<0.000000e+00> : vector<8xf32>
    %301 = vector.multi_reduction <add>, %300, %cst_115 [1] : vector<8x8xf32> to vector<8xf32>
    %302 = vector.shape_cast %301 : vector<8xf32> to vector<8x1xf32>
    %303 = vector.broadcast %302 : vector<8x1xf32> to vector<8x8xf32>
    %304 = arith.divf %300, %303 : vector<8x8xf32>
    %305 = arith.truncf %304 : vector<8x8xf32> to vector<8x8xbf16>
    %306 = arith.truncf %290 : vector<8x8xf32> to vector<8x8xbf16>
    %cst_116 = arith.constant dense<0.000000e+00> : vector<8x8xf32>
    %307 = tpu.matmul %305, %306, %cst_116 {dimension_numbers = #tpu.dot_dimension_numbers<[1], [0], [0], [1], [0, 0, 1, 1], [], []>} : vector<8x8xbf16>, vector<8x8xbf16>, vector<8x8xf32> -> vector<8x8xf32>
    %308 = vector.extract_strided_slice %246 {offsets = [8, 8], sizes = [8, 8], strides = [1, 1]} : vector<16x48xf32> to vector<8x8xf32>
    %309 = vector.extract_strided_slice %246 {offsets = [8, 24], sizes = [8, 8], strides = [1, 1]} : vector<16x48xf32> to vector<8x8xf32>
    %310 = vector.extract_strided_slice %246 {offsets = [8, 40], sizes = [8, 8], strides = [1, 1]} : vector<16x48xf32> to vector<8x8xf32>
    %311 = arith.truncf %308 : vector<8x8xf32> to vector<8x8xbf16>
    %312 = arith.truncf %309 : vector<8x8xf32> to vector<8x8xbf16>
    %cst_117 = arith.constant dense<0.000000e+00> : vector<8x8xf32>
    %313 = tpu.matmul %311, %312, %cst_117 {dimension_numbers = #tpu.dot_dimension_numbers<[1], [1], [0], [0], [0, 0, 1, 0], [], []>} : vector<8x8xbf16>, vector<8x8xbf16>, vector<8x8xf32> -> vector<8x8xf32>
    %cst_118 = arith.constant -1.000000e+30 : f32
    %314 = vector.broadcast %cst_118 : f32 to vector<8x8xf32>
    %315 = arith.select %3, %313, %314 : vector<8x8xi1>, vector<8x8xf32>
    %cst_119 = arith.constant dense<0xFF800000> : vector<8xf32>
    %316 = vector.multi_reduction <maximumf>, %315, %cst_119 [1] : vector<8x8xf32> to vector<8xf32>
    %317 = vector.shape_cast %316 : vector<8xf32> to vector<8x1xf32>
    %318 = vector.broadcast %317 : vector<8x1xf32> to vector<8x8xf32>
    %319 = arith.subf %315, %318 : vector<8x8xf32>
    %320 = math.exp %319 : vector<8x8xf32>
    %cst_120 = arith.constant dense<0.000000e+00> : vector<8xf32>
    %321 = vector.multi_reduction <add>, %320, %cst_120 [1] : vector<8x8xf32> to vector<8xf32>
    %322 = vector.shape_cast %321 : vector<8xf32> to vector<8x1xf32>
    %323 = vector.broadcast %322 : vector<8x1xf32> to vector<8x8xf32>
    %324 = arith.divf %320, %323 : vector<8x8xf32>
    %325 = arith.truncf %324 : vector<8x8xf32> to vector<8x8xbf16>
    %326 = arith.truncf %310 : vector<8x8xf32> to vector<8x8xbf16>
    %cst_121 = arith.constant dense<0.000000e+00> : vector<8x8xf32>
    %327 = tpu.matmul %325, %326, %cst_121 {dimension_numbers = #tpu.dot_dimension_numbers<[1], [0], [0], [1], [0, 0, 1, 1], [], []>} : vector<8x8xbf16>, vector<8x8xbf16>, vector<8x8xf32> -> vector<8x8xf32>
    %328 = tpu.concatenate %307, %327 in 1 : vector<8x8xf32>, vector<8x8xf32> -> vector<8x16xf32>
    %329 = tpu.concatenate %287, %328 in 0 : vector<8x16xf32>, vector<8x16xf32> -> vector<16x16xf32>
    %330 = arith.truncf %329 : vector<16x16xf32> to vector<16x16xbf16>
    %c1_122 = arith.constant 1 : index
    %c0_123 = arith.constant 0 : index
    %c0_124 = arith.constant 0 : index
    %331 = vector.load %arg5[%c1_122, %c0_123, %c0_124] : memref<2x16x32xbf16, #tpu.memory_space<vmem>>, vector<1x16x32xbf16>
    %332 = vector.shape_cast %331 : vector<1x16x32xbf16> to vector<16x32xbf16>
    %cst_125 = arith.constant dense<0.000000e+00> : vector<16x32xf32>
    %333 = tpu.matmul %330, %332, %cst_125 {dimension_numbers = #tpu.dot_dimension_numbers<[1], [0], [0], [1], [0, 0, 1, 1], [], []>} : vector<16x16xbf16>, vector<16x32xbf16>, vector<16x32xf32> -> vector<16x32xf32>
    %c1_126 = arith.constant 1 : index
    %c0_127 = arith.constant 0 : index
    %c0_128 = arith.constant 0 : index
    %334 = vector.load %arg6[%c1_126, %c0_127, %c0_128] : memref<2x1x32xf32, #tpu.memory_space<vmem>>, vector<1x1x32xf32>
    %335 = vector.shape_cast %334 : vector<1x1x32xf32> to vector<1x32xf32>
    %336 = vector.broadcast %335 : vector<1x32xf32> to vector<16x32xf32>
    %337 = arith.addf %333, %336 : vector<16x32xf32>
    %338 = arith.addf %212, %337 : vector<16x32xf32>
    %c1_129 = arith.constant 1 : index
    %c0_130 = arith.constant 0 : index
    %c0_131 = arith.constant 0 : index
    %339 = vector.load %arg7[%c1_129, %c0_130, %c0_131] : memref<2x1x32xf32, #tpu.memory_space<vmem>>, vector<1x1x32xf32>
    %340 = vector.shape_cast %339 : vector<1x1x32xf32> to vector<1x32xf32>
    %c1_132 = arith.constant 1 : index
    %c0_133 = arith.constant 0 : index
    %c0_134 = arith.constant 0 : index
    %341 = vector.load %arg8[%c1_132, %c0_133, %c0_134] : memref<2x1x32xf32, #tpu.memory_space<vmem>>, vector<1x1x32xf32>
    %342 = vector.shape_cast %341 : vector<1x1x32xf32> to vector<1x32xf32>
    %cst_135 = arith.constant dense<0.000000e+00> : vector<16xf32>
    %343 = vector.multi_reduction <add>, %338, %cst_135 [1] : vector<16x32xf32> to vector<16xf32>
    %344 = vector.shape_cast %343 : vector<16xf32> to vector<16x1xf32>
    %cst_136 = arith.constant 3.200000e+01 : f32
    %345 = vector.broadcast %cst_136 : f32 to vector<16x1xf32>
    %346 = arith.divf %344, %345 : vector<16x1xf32>
    %347 = vector.broadcast %346 : vector<16x1xf32> to vector<16x32xf32>
    %348 = arith.subf %338, %347 : vector<16x32xf32>
    %349 = arith.mulf %348, %348 : vector<16x32xf32>
    %cst_137 = arith.constant dense<0.000000e+00> : vector<16xf32>
    %350 = vector.multi_reduction <add>, %349, %cst_137 [1] : vector<16x32xf32> to vector<16xf32>
    %351 = vector.shape_cast %350 : vector<16xf32> to vector<16x1xf32>
    %cst_138 = arith.constant 3.200000e+01 : f32
    %352 = vector.broadcast %cst_138 : f32 to vector<16x1xf32>
    %353 = arith.divf %351, %352 : vector<16x1xf32>
    %354 = vector.broadcast %346 : vector<16x1xf32> to vector<16x32xf32>
    %355 = arith.subf %338, %354 : vector<16x32xf32>
    %cst_139 = arith.constant 9.99999974E-6 : f32
    %356 = vector.broadcast %cst_139 : f32 to vector<16x1xf32>
    %357 = arith.addf %353, %356 : vector<16x1xf32>
    %358 = math.rsqrt %357 : vector<16x1xf32>
    %359 = vector.broadcast %358 : vector<16x1xf32> to vector<16x32xf32>
    %360 = arith.mulf %355, %359 : vector<16x32xf32>
    %361 = vector.broadcast %340 : vector<1x32xf32> to vector<16x32xf32>
    %362 = arith.mulf %360, %361 : vector<16x32xf32>
    %363 = vector.broadcast %342 : vector<1x32xf32> to vector<16x32xf32>
    %364 = arith.addf %362, %363 : vector<16x32xf32>
    %365 = arith.truncf %364 : vector<16x32xf32> to vector<16x32xbf16>
    %c1_140 = arith.constant 1 : index
    %c0_141 = arith.constant 0 : index
    %c0_142 = arith.constant 0 : index
    %366 = vector.load %arg9[%c1_140, %c0_141, %c0_142] : memref<2x32x64xbf16, #tpu.memory_space<vmem>>, vector<1x32x64xbf16>
    %367 = vector.shape_cast %366 : vector<1x32x64xbf16> to vector<32x64xbf16>
    %cst_143 = arith.constant dense<0.000000e+00> : vector<16x64xf32>
    %368 = tpu.matmul %365, %367, %cst_143 {dimension_numbers = #tpu.dot_dimension_numbers<[1], [0], [0], [1], [0, 0, 1, 1], [], []>} : vector<16x32xbf16>, vector<32x64xbf16>, vector<16x64xf32> -> vector<16x64xf32>
    %c1_144 = arith.constant 1 : index
    %c0_145 = arith.constant 0 : index
    %c0_146 = arith.constant 0 : index
    %369 = vector.load %arg10[%c1_144, %c0_145, %c0_146] : memref<2x1x64xf32, #tpu.memory_space<vmem>>, vector<1x1x64xf32>
    %370 = vector.shape_cast %369 : vector<1x1x64xf32> to vector<1x64xf32>
    %371 = vector.broadcast %370 : vector<1x64xf32> to vector<16x64xf32>
    %372 = arith.addf %368, %371 : vector<16x64xf32>
    %cst_147 = arith.constant 5.000000e-01 : f32
    %373 = vector.broadcast %cst_147 : f32 to vector<16x64xf32>
    %374 = arith.mulf %373, %372 : vector<16x64xf32>
    %cst_148 = arith.constant 0.707106769 : f32
    %375 = vector.broadcast %cst_148 : f32 to vector<16x64xf32>
    %376 = arith.mulf %372, %375 : vector<16x64xf32>
    %377 = math.absf %376 : vector<16x64xf32>
    %cst_149 = arith.constant 0.327591091 : f32
    %378 = vector.broadcast %cst_149 : f32 to vector<16x64xf32>
    %379 = arith.mulf %378, %377 : vector<16x64xf32>
    %cst_150 = arith.constant 1.000000e+00 : f32
    %380 = vector.broadcast %cst_150 : f32 to vector<16x64xf32>
    %381 = arith.addf %380, %379 : vector<16x64xf32>
    %cst_151 = arith.constant 1.000000e+00 : f32
    %382 = vector.broadcast %cst_151 : f32 to vector<16x64xf32>
    %383 = arith.divf %382, %381 : vector<16x64xf32>
    %cst_152 = arith.constant 1.06140542 : f32
    %384 = vector.broadcast %cst_152 : f32 to vector<16x64xf32>
    %385 = arith.mulf %383, %384 : vector<16x64xf32>
    %cst_153 = arith.constant -1.45315206 : f32
    %386 = vector.broadcast %cst_153 : f32 to vector<16x64xf32>
    %387 = arith.addf %386, %385 : vector<16x64xf32>
    %388 = arith.mulf %383, %387 : vector<16x64xf32>
    %cst_154 = arith.constant 1.42141378 : f32
    %389 = vector.broadcast %cst_154 : f32 to vector<16x64xf32>
    %390 = arith.addf %389, %388 : vector<16x64xf32>
    %391 = arith.mulf %383, %390 : vector<16x64xf32>
    %cst_155 = arith.constant -0.284496725 : f32
    %392 = vector.broadcast %cst_155 : f32 to vector<16x64xf32>
    %393 = arith.addf %392, %391 : vector<16x64xf32>
    %394 = arith.mulf %383, %393 : vector<16x64xf32>
    %cst_156 = arith.constant 0.254829586 : f32
    %395 = vector.broadcast %cst_156 : f32 to vector<16x64xf32>
    %396 = arith.addf %395, %394 : vector<16x64xf32>
    %397 = arith.mulf %383, %396 : vector<16x64xf32>
    %cst_157 = arith.constant 0.000000e+00 : f32
    %398 = vector.broadcast %cst_157 : f32 to vector<16x64xf32>
    %399 = arith.subf %398, %377 : vector<16x64xf32>
    %400 = arith.mulf %399, %377 : vector<16x64xf32>
    %401 = math.exp %400 : vector<16x64xf32>
    %402 = arith.mulf %397, %401 : vector<16x64xf32>
    %cst_158 = arith.constant 1.000000e+00 : f32
    %403 = vector.broadcast %cst_158 : f32 to vector<16x64xf32>
    %404 = arith.subf %403, %402 : vector<16x64xf32>
    %cst_159 = arith.constant 0.000000e+00 : f32
    %405 = vector.broadcast %cst_159 : f32 to vector<16x64xf32>
    %406 = arith.cmpf olt, %376, %405 : vector<16x64xf32>
    %cst_160 = arith.constant 0.000000e+00 : f32
    %407 = vector.broadcast %cst_160 : f32 to vector<16x64xf32>
    %408 = arith.subf %407, %404 : vector<16x64xf32>
    %409 = arith.select %406, %408, %404 : vector<16x64xi1>, vector<16x64xf32>
    %cst_161 = arith.constant 1.000000e+00 : f32
    %410 = vector.broadcast %cst_161 : f32 to vector<16x64xf32>
    %411 = arith.addf %410, %409 : vector<16x64xf32>
    %412 = arith.mulf %374, %411 : vector<16x64xf32>
    %413 = arith.truncf %412 : vector<16x64xf32> to vector<16x64xbf16>
    %c1_162 = arith.constant 1 : index
    %c0_163 = arith.constant 0 : index
    %c0_164 = arith.constant 0 : index
    %414 = vector.load %arg11[%c1_162, %c0_163, %c0_164] : memref<2x64x32xbf16, #tpu.memory_space<vmem>>, vector<1x64x32xbf16>
    %415 = vector.shape_cast %414 : vector<1x64x32xbf16> to vector<64x32xbf16>
    %cst_165 = arith.constant dense<0.000000e+00> : vector<16x32xf32>
    %416 = tpu.matmul %413, %415, %cst_165 {dimension_numbers = #tpu.dot_dimension_numbers<[1], [0], [0], [1], [0, 0, 1, 1], [], []>} : vector<16x64xbf16>, vector<64x32xbf16>, vector<16x32xf32> -> vector<16x32xf32>
    %c1_166 = arith.constant 1 : index
    %c0_167 = arith.constant 0 : index
    %c0_168 = arith.constant 0 : index
    %417 = vector.load %arg12[%c1_166, %c0_167, %c0_168] : memref<2x1x32xf32, #tpu.memory_space<vmem>>, vector<1x1x32xf32>
    %418 = vector.shape_cast %417 : vector<1x1x32xf32> to vector<1x32xf32>
    %419 = vector.broadcast %418 : vector<1x32xf32> to vector<16x32xf32>
    %420 = arith.addf %416, %419 : vector<16x32xf32>
    %421 = arith.addf %338, %420 : vector<16x32xf32>
    %c0_169 = arith.constant 0 : index
    %c0_170 = arith.constant 0 : index
    %422 = vector.load %arg13[%c0_169, %c0_170] : memref<1x32xf32, #tpu.memory_space<vmem>>, vector<1x32xf32>
    %c0_171 = arith.constant 0 : index
    %c0_172 = arith.constant 0 : index
    %423 = vector.load %arg14[%c0_171, %c0_172] : memref<1x32xf32, #tpu.memory_space<vmem>>, vector<1x32xf32>
    %cst_173 = arith.constant dense<0.000000e+00> : vector<16xf32>
    %424 = vector.multi_reduction <add>, %421, %cst_173 [1] : vector<16x32xf32> to vector<16xf32>
    %425 = vector.shape_cast %424 : vector<16xf32> to vector<16x1xf32>
    %cst_174 = arith.constant 3.200000e+01 : f32
    %426 = vector.broadcast %cst_174 : f32 to vector<16x1xf32>
    %427 = arith.divf %425, %426 : vector<16x1xf32>
    %428 = vector.broadcast %427 : vector<16x1xf32> to vector<16x32xf32>
    %429 = arith.subf %421, %428 : vector<16x32xf32>
    %430 = arith.mulf %429, %429 : vector<16x32xf32>
    %cst_175 = arith.constant dense<0.000000e+00> : vector<16xf32>
    %431 = vector.multi_reduction <add>, %430, %cst_175 [1] : vector<16x32xf32> to vector<16xf32>
    %432 = vector.shape_cast %431 : vector<16xf32> to vector<16x1xf32>
    %cst_176 = arith.constant 3.200000e+01 : f32
    %433 = vector.broadcast %cst_176 : f32 to vector<16x1xf32>
    %434 = arith.divf %432, %433 : vector<16x1xf32>
    %435 = vector.broadcast %427 : vector<16x1xf32> to vector<16x32xf32>
    %436 = arith.subf %421, %435 : vector<16x32xf32>
    %cst_177 = arith.constant 9.99999974E-6 : f32
    %437 = vector.broadcast %cst_177 : f32 to vector<16x1xf32>
    %438 = arith.addf %434, %437 : vector<16x1xf32>
    %439 = math.rsqrt %438 : vector<16x1xf32>
    %440 = vector.broadcast %439 : vector<16x1xf32> to vector<16x32xf32>
    %441 = arith.mulf %436, %440 : vector<16x32xf32>
    %442 = vector.broadcast %422 : vector<1x32xf32> to vector<16x32xf32>
    %443 = arith.mulf %441, %442 : vector<16x32xf32>
    %444 = vector.broadcast %423 : vector<1x32xf32> to vector<16x32xf32>
    %445 = arith.addf %443, %444 : vector<16x32xf32>
    %446 = arith.truncf %445 : vector<16x32xf32> to vector<16x32xbf16>
    %c0_178 = arith.constant 0 : index
    %c0_179 = arith.constant 0 : index
    %447 = vector.load %arg15[%c0_178, %c0_179] : memref<32x128xbf16, #tpu.memory_space<vmem>>, vector<32x128xbf16>
    %cst_180 = arith.constant dense<0.000000e+00> : vector<16x128xf32>
    %448 = tpu.matmul %446, %447, %cst_180 {dimension_numbers = #tpu.dot_dimension_numbers<[1], [0], [0], [1], [0, 0, 1, 1], [], []>} : vector<16x32xbf16>, vector<32x128xbf16>, vector<16x128xf32> -> vector<16x128xf32>
    %c0_181 = arith.constant 0 : index
    %c0_182 = arith.constant 0 : index
    %449 = vector.load %arg16[%c0_181, %c0_182] : memref<1x128xf32, #tpu.memory_space<vmem>>, vector<1x128xf32>
    %450 = vector.broadcast %449 : vector<1x128xf32> to vector<16x128xf32>
    %451 = arith.addf %448, %450 : vector<16x128xf32>
    %c0_183 = arith.constant 0 : index
    %c0_184 = arith.constant 0 : index
    %452 = vector.load %arg17[%c0_183, %c0_184] : memref<16x128xf32, #tpu.memory_space<vmem>>, vector<16x128xf32>
    tpu.vector_store %arg17[%c0_183, %c0_184], %451 {strides = array<i32>} : memref<16x128xf32, #tpu.memory_space<vmem>>, vector<16x128xf32>,
    return
  }
}

</mosaic_0001>

<bundles_post_ra>
// kernel: forward.1
= control target key start
LH: loop header
LB: loop body
LE: loop exit
PB: predicated region body
PF: predicated region fallthrough
CT: control target
= control target key end

     0   :  { %vm66_vm0 = vcmask 261120   ;;  %v2389_v14 = vmov 0.0   ;;  %vm2390_vm1 = vmmov 0   ;;  %s2391_s25 = smov 104   ;;  %s2393_s27 = smov 120   ;;  %vm182_vm2 = vcmask 64512   ;;  %s2897_s0 = inlined_call_operand.vmem [shape: f32[16,32], index: 0, kind: input, shape index: {}]   ;;  %s2898_s3 = inlined_call_operand.vmem [shape: bf16[2,32,48], index: 3, kind: input, shape index: {}]   ;;  %s2899_s1 = inlined_call_operand.vmem [shape: f32[2,1,32], index: 1, kind: input, shape index: {}]   ;;  %s2900_s2 = inlined_call_operand.vmem [shape: f32[2,1,32], index: 2, kind: input, shape index: {}]   ;;  %s2901_s4 = inlined_call_operand.vmem [shape: f32[2,1,48], index: 4, kind: input, shape index: {}]   ;;  %s2902_s5 = inlined_call_operand.vmem [shape: bf16[2,16,32], index: 5, kind: input, shape index: {}]   ;;  %s2903_s6 = inlined_call_operand.vmem [shape: f32[2,1,32], index: 6, kind: input, shape index: {}]   ;;  %s2904_s9 = inlined_call_operand.vmem [shape: bf16[2,32,64], index: 9, kind: input, shape index: {}]   ;;  %s2905_s7 = inlined_call_operand.vmem [shape: f32[2,1,32], index: 7, kind: input, shape index: {}]   ;;  %s2906_s8 = inlined_call_operand.vmem [shape: f32[2,1,32], index: 8, kind: input, shape index: {}]   ;;  %s2907_s11 = inlined_call_operand.vmem [shape: bf16[2,64,32], index: 11, kind: input, shape index: {}]   ;;  %s2908_s10 = inlined_call_operand.vmem [shape: f32[2,1,64], index: 10, kind: input, shape index: {}]   ;;  %s2909_s12 = inlined_call_operand.vmem [shape: f32[2,1,32], index: 12, kind: input, shape index: {}]   ;;  %s2910_s15 = inlined_call_operand.vmem [shape: bf16[32,128], index: 15, kind: input, shape index: {}]   ;;  %s2911_s13 = inlined_call_operand.vmem [shape: f32[1,32], index: 13, kind: input, shape index: {}]   ;;  %s2912_s14 = inlined_call_operand.vmem [shape: f32[1,32], index: 14, kind: input, shape index: {}]   ;;  %s2913_s16 = inlined_call_operand.vmem [shape: f32[1,128], index: 16, kind: input, shape index: {}]   ;;  %s2914_s17 = inlined_call_operand.vmem [shape: f32[16,128], index: 17, kind: output, shape index: {}]  }
   0x1   :  { %2917 = sst [smem:[#allocation2_spill]] %s2897_s0  ;;  %2111 = vmatprep.subr.bf16.mxu0 %v2389_v14  ;;  %2115 = vmatprep.mubr.msk.bf16.mxu0 %vm2390_vm1, %v2389_v14  ;;  %v1960_v25 = vld [vmem:[%s2899_s1] ss:$0 sm:$0xff]  ;;  %v59_v53 = vlaneseq  ;;  %s2394_s28 = smov 88   ;;  %vm247_vm4 = vcmask 1043456   ;;  %vm650_vm5 = vcmask 130048  }
   0x2   :  { %2918 = sst [smem:[#allocation3_spill]] %s2898_s3  ;;  %2119 = vmatprep.subr.bf16.mxu1 %v2389_v14  ;;  %2121 = vmatprep.mubr.msk.bf16.mxu1 %vm2390_vm1, %v2389_v14  ;;  %v1961_v29 = vld [vmem:[%s2900_s2] ss:$0 sm:$0xff]  ;;  %s2395_s29 = smov 96   ;;  %vm903_vm8 = vcmask 523264  }
   0x3   :  { %s2919_s26 = sld [smem:[#allocation2_spill]]  ;;  %v1962_v34 = vld [vmem:[%s2901_s4] ss:$0 sm:$0xff]  ;;  %v60_v54 = vshrl.u32 %v59_v53, 7  ;;  %v62_v55 = vand.u32 127, %v59_v53  ;;  %s2396_s19 = smov 8  }
   0x4   :  { %s2920_s30 = sld [smem:[#allocation3_spill]] }
   0x5   :  { %vm2569_vm3 = vcmp.le.s32.totalorder %v62_v55, %v60_v54 }
   0x9   :  { %v2490_v0 = vld [vmem:[%s2919_s26] sm:$0xff]  ;;  %v2495_v1 = vld [vmem:[%s2919_s26 + $0x8] sm:$0xff]  ;;  %s2392_s26 = smov 112  }
   0xa   :  { %v67_v2 = vsel %vm66_vm0, %v2490_v0, 0.0  ;;  %v70_v3 = vsel %vm66_vm0, %v2495_v1, 0.0  ;;  %v2301_v15 = vld [vmem:[%s2920_s30 + $0x8] sm:$0xff]   ;;  %v2302_v16 = vld [vmem:[%s2920_s30] sm:$0xff]  }
   0xb   :  { %68 = vadd.xlane.f32.xlu0 %v67_v2  ;;  %2112 = vmatpush3.bf16.msra.mxu0 %v2301_v15 }
   0xc   :  { %2113 = vmatprep.subr.bf16.mxu0 %v2389_v14 }
   0xf   :  { %71 = vadd.xlane.f32.xlu0 %v70_v3  ;;  %2114 = vmatpush3.bf16.msra.mxu0 %v2302_v16 }
  0x10   :  { %2125 = vmatprep.subr.bf16.mxu0 %v2389_v14 }
  0x94   :  { %v69_v4 = vpop.xlane.xlu0 %68 }
  0x95   :  { %v74_v5 = vmul.f32 0.03125, %v69_v4 }
  0x97   :  { %v76_v6 = vsub.f32 %v2490_v0, %v74_v5 }
  0x98   :  { %v72_v7 = vpop.xlane.xlu0 %71 }
  0x99   :  { %v75_v8 = vmul.f32 0.03125, %v72_v7  ;;  %v78_v9 = vmul.f32 %v76_v6, %v76_v6 }
  0x9b   :  { %v77_v10 = vsub.f32 %v2495_v1, %v75_v8  ;;  %v80_v11 = vsel %vm66_vm0, %v78_v9, 0.0 }
  0x9c   :  { %81 = vadd.xlane.f32.xlu1 %v80_v11 }
  0x9d   :  { %v79_v12 = vmul.f32 %v77_v10, %v77_v10 }
  0x9f   :  { %v83_v13 = vsel %vm66_vm0, %v79_v12, 0.0 }
  0xa0   :  { %84 = vadd.xlane.f32.xlu1 %v83_v13 }
 0x125   :  { %v82_v17 = vpop.xlane.xlu1 %81 }
 0x126   :  { %v86_v18 = vmul.f32 0.03125, %v82_v17 }
 0x128   :  { %v88_v19 = vadd.f32 1e-05, %v86_v18 }
 0x129   :  { %v85_v20 = vpop.xlane.xlu1 %84 }
 0x12a   :  { %2321 = vrsqrt.f32 %v88_v19  ;;  %v87_v21 = vmul.f32 0.03125, %v85_v20 }
 0x12c   :  { %v89_v22 = vadd.f32 1e-05, %v87_v21 }
 0x12e   :  { %2323 = vrsqrt.f32 %v89_v22 }
 0x137   :  { %v2322_v23 = vpop.eup %2321 }
 0x138   :  { %v92_v24 = vmul.f32 %v2322_v23, %v76_v6 }
 0x13a   :  { %v100_v28 = vmul.f32 %v1960_v25, %v92_v24 }
 0x13b   :  { %v2324_v26 = vpop.eup %2323 }
 0x13c   :  { %v93_v27 = vmul.f32 %v2324_v26, %v77_v10  ;;  %v108_v31 = vadd.f32 %v1961_v29, %v100_v28 }
 0x13e   :  { %v101_v30 = vmul.f32 %v1960_v25, %v93_v27 }
 0x140   :  { %v109_v32 = vadd.f32 %v1961_v29, %v101_v30 }
 0x142   :  { %v110_v33 = vpack.c.bf16 %v109_v32, %v108_v31 }
 0x144   :  { %2116 = vmatmul.mubr.msk.bf16.vlgmr.msra.gmra.mxu0 %vm66_vm0, %v110_v33 }
 0x145   :  { %2127 = vmatprep.mubr.msk.bf16.mxu0 %vm2390_vm1, %v2389_v14 }
 0x204   :  { %v171_v35 = vpop.f32.mrf.mxu0 }
 0x205   :  { %v172_v36 = vadd.f32 %v1962_v34, %v171_v35 }
 0x206   :  { %v2117_v37 = vpop.f32.mrf.mxu0 }
 0x207   :  { %v2531_v38 = vpack.c.bf16 %v172_v36, %v172_v36 }
 0x208   :  { %v174_v39 = vpop.f32.mrf.mxu0 }
 0x209   :  { %v175_v40 = vadd.f32 %v1962_v34, %v174_v39  ;;  %293 = vrot.lane.b32.xlu1 %v2531_v38, %s2391_s25  ;;  %180 = vrot.lane.b32.xlu0 %v2531_v38, %s2392_s26 }
 0x20a   :  { %v2118_v41 = vpop.f32.mrf.mxu0 }
 0x20b   :  { %v2537_v42 = vpack.c.bf16 %v175_v40, %v175_v40 }
 0x20d   :  { %291 = vrot.lane.b32.xlu1 %v2531_v38, %s2393_s27  ;;  %520 = vrot.lane.b32.xlu0 %v2537_v42, %s2391_s25 }
 0x211   :  { %409 = vrot.lane.b32.xlu1 %v2537_v42, %s2392_s26 }
 0x215   :  { %518 = vrot.lane.b32.xlu1 %v2537_v42, %s2393_s27 }
 0x27b   :  { %v181_v43 = vpop.permute.xlu0 %180  ;;  %v294_v45 = vpop.permute.xlu1 %293 }
 0x27c   :  { %v187_v44 = vsel %vm182_vm2, %v181_v43, 0  ;;  %v299_v47 = vsel %vm182_vm2, %v294_v45, 0 }
 0x27d   :  { %2120 = vmatpush3.bf16.xpose.msra.mxu1 %v187_v44 }
 0x27e   :  { %2131 = vmatprep.subr.bf16.mxu1 %v2389_v14 }
 0x27f   :  { %v292_v46 = vpop.permute.xlu1 %291  ;;  %v521_v50 = vpop.permute.xlu0 %520 }
 0x280   :  { %v526_v51 = vsel %vm182_vm2, %v521_v50, 0 }
 0x283   :  { %v410_v48 = vpop.permute.xlu1 %409 }
 0x284   :  { %2122 = vmatmul.mubr.msk.bf16.vlgmr.msra.gmra.mxu1 %vm182_vm2, %v2531_v38  ;;  %v415_v49 = vsel %vm182_vm2, %v410_v48, 0 }
 0x285   :  { %2132 = vmatpush3.bf16.xpose.msra.mxu1 %v299_v47  ;;  %2133 = vmatprep.mubr.msk.bf16.mxu1 %vm2390_vm1, %v2389_v14 }
 0x286   :  { %2143 = vmatprep.subr.bf16.mxu1 %v2389_v14 }
 0x287   :  { %v519_v52 = vpop.permute.xlu1 %518 }
 0x28c   :  { %2134 = vmatmul.mubr.msk.bf16.vlgmr.msra.gmra.mxu1 %vm182_vm2, %v292_v46 }
 0x28d   :  { %2144 = vmatpush3.bf16.xpose.msra.mxu1 %v415_v49  ;;  %2145 = vmatprep.mubr.msk.bf16.mxu1 %vm2390_vm1, %v2389_v14 }
 0x28e   :  { %2155 = vmatprep.subr.bf16.mxu1 %v2389_v14 }
 0x294   :  { %2146 = vmatmul.mubr.msk.bf16.vlgmr.msra.gmra.mxu1 %vm182_vm2, %v2537_v42 }
 0x295   :  { %2156 = vmatpush3.bf16.xpose.msra.mxu1 %v526_v51  ;;  %2157 = vmatprep.mubr.msk.bf16.mxu1 %vm2390_vm1, %v2389_v14 }
 0x296   :  { %2167 = vmatprep.subr.bf16.mxu1 %v2389_v14 }
 0x29c   :  { %2158 = vmatmul.mubr.msk.bf16.vlgmr.msra.gmra.mxu1 %vm182_vm2, %v519_v52 }
 0x29d   :  { %2169 = vmatprep.mubr.msk.bf16.mxu1 %vm2390_vm1, %v2389_v14 }
 0x344   :  { %v223_v57 = vpop.f32.mrf.mxu1 }
 0x345   :  { %v229_v58 = vsel %vm2569_vm3, %v223_v57, -1e+30 }
 0x346   :  { %v2123_v59 = vpop.f32.mrf.mxu1  ;;  %v230_v60 = vsel %vm182_vm2, %v229_v58, -inf }
 0x347   :  { %231 = vmax.xlane.f32.xlu0 %v230_v60 }
 0x348   :  { %v226_v61 = vpop.f32.mrf.mxu1 }
 0x34a   :  { %v2124_v62 = vpop.f32.mrf.mxu1 }
 0x34c   :  { %v335_v63 = vpop.f32.mrf.mxu1 }
 0x34d   :  { %v341_v2 = vsel %vm2569_vm3, %v335_v63, -1e+30 }
 0x34e   :  { %v2135_v3 = vpop.f32.mrf.mxu1  ;;  %v342_v4 = vsel %vm182_vm2, %v341_v2, -inf }
 0x34f   :  { %343 = vmax.xlane.f32.xlu1 %v342_v4  ;;  %v2303_v3 = vld [vmem:[%s2902_s5] sm:$0xff]  }
 0x350   :  { %v338_v5 = vpop.f32.mrf.mxu1  ;;  %2168 = vmatpush3.bf16.msra.mxu1 %v2303_v3 }
 0x351   :  { %2181 = vmatprep.subr.bf16.mxu1 %v2389_v14 }
 0x352   :  { %v2136_v6 = vpop.f32.mrf.mxu1 }
 0x354   :  { %v451_v7 = vpop.f32.mrf.mxu1 }
 0x355   :  { %v457_v8 = vsel %vm2569_vm3, %v451_v7, -1e+30 }
 0x356   :  { %v2147_v9 = vpop.f32.mrf.mxu1  ;;  %v458_v10 = vsel %vm182_vm2, %v457_v8, -inf }
 0x357   :  { %459 = vmax.xlane.f32.xlu0 %v458_v10 }
 0x358   :  { %v454_v11 = vpop.f32.mrf.mxu1 }
 0x35a   :  { %v2148_v12 = vpop.f32.mrf.mxu1 }
 0x35c   :  { %v562_v13 = vpop.f32.mrf.mxu1 }
 0x35d   :  { %v568_v15 = vsel %vm2569_vm3, %v562_v13, -1e+30 }
 0x35e   :  { %v2159_v16 = vpop.f32.mrf.mxu1  ;;  %v569_v17 = vsel %vm182_vm2, %v568_v15, -inf }
 0x35f   :  { %570 = vmax.xlane.f32.xlu0 %v569_v17 }
 0x360   :  { %v565_v18 = vpop.f32.mrf.mxu1 }
 0x362   :  { %v2160_v19 = vpop.f32.mrf.mxu1 }
 0x3d0   :  { %v232_v20 = vpop.xlane.xlu0 %231 }
 0x3d1   :  { %v233_v21 = vsub.f32 %v229_v58, %v232_v20 }
 0x3d3   :  { %v234_v22 = vmul.f32 1.442695, %v233_v21 }
 0x3d5   :  { %2325 = vpow2.f32 %v234_v22 }
 0x3d8   :  { %v344_v23 = vpop.xlane.xlu1 %343 }
 0x3d9   :  { %v345_v24 = vsub.f32 %v341_v2, %v344_v23 }
 0x3db   :  { %v346_v25 = vmul.f32 1.442695, %v345_v24 }
 0x3dd   :  { %2327 = vpow2.f32 %v346_v25 }
 0x3e0   :  { %v460_v26 = vpop.xlane.xlu0 %459 }
 0x3e1   :  { %v461_v27 = vsub.f32 %v457_v8, %v460_v26 }
 0x3e2   :  { %v2326_v28 = vpop.eup %2325 }
 0x3e3   :  { %v462_v29 = vmul.f32 1.442695, %v461_v27  ;;  %v236_v30 = vsel %vm182_vm2, %v2326_v28, 0.0 }
 0x3e4   :  { %237 = vadd.xlane.f32.xlu0 %v236_v30 }
 0x3e5   :  { %2329 = vpow2.f32 %v462_v29 }
 0x3e8   :  { %v571_v35 = vpop.xlane.xlu0 %570 }
 0x3e9   :  { %v572_v36 = vsub.f32 %v568_v15, %v571_v35 }
 0x3ea   :  { %v2328_v31 = vpop.eup %2327 }
 0x3eb   :  { %v348_v32 = vsel %vm182_vm2, %v2328_v31, 0.0  ;;  %v573_v37 = vmul.f32 1.442695, %v572_v36 }
 0x3ec   :  { %349 = vadd.xlane.f32.xlu1 %v348_v32 }
 0x3ed   :  { %2331 = vpow2.f32 %v573_v37 }
 0x3f2   :  { %v2330_v33 = vpop.eup %2329 }
 0x3f3   :  { %v464_v34 = vsel %vm182_vm2, %v2330_v33, 0.0 }
 0x3f4   :  { %465 = vadd.xlane.f32.xlu0 %v464_v34 }
 0x3fa   :  { %v2332_v39 = vpop.eup %2331 }
 0x3fb   :  { %v575_v40 = vsel %vm182_vm2, %v2332_v39, 0.0 }
 0x3fd   :  { %354 = vrot.lane.b32.xlu1 %v2531_v38, %s2394_s28 }
 0x401   :  { %470 = vrot.lane.b32.xlu1 %v2537_v42, %s2395_s29 }
 0x40a   :  { %242 = vrot.lane.b32.xlu0 %v2531_v38, %s2395_s29 }
 0x425   :  { %576 = vadd.xlane.f32.xlu1 %v575_v40 }
 0x436   :  { %581 = vrot.lane.b32.xlu1 %v2537_v42, %s2394_s28 }
 0x46d   :  { %v238_v41 = vpop.xlane.xlu0 %237 }
 0x46e   :  { %2333 = vrcp.f32 %v238_v41 }
 0x475   :  { %v350_v43 = vpop.xlane.xlu1 %349 }
 0x476   :  { %2335 = vrcp.f32 %v350_v43 }
 0x479   :  { %v355_v48 = vpop.permute.xlu1 %354 }
 0x47a   :  { %v360_v42 = vsel %vm247_vm4, %v355_v48, 0  ;;  %v2304_v48 = vld [vmem:[%s2904_s9 + $0x8] sm:$0xff]  }
 0x47b   :  { %v2334_v44 = vpop.eup %2333 }
 0x47c   :  { %v240_v46 = vmul.f32 %v2334_v44, %v2326_v28  ;;  %v1974_v28 = vld [vmem:[%s2903_s6] ss:$0 sm:$0xff] }
 0x47d   :  { %v466_v45 = vpop.xlane.xlu0 %465  ;;  %v471_v52 = vpop.permute.xlu1 %470 }
 0x47e   :  { %2337 = vrcp.f32 %v466_v45  ;;  %v241_v49 = vpack.c.bf16 %v240_v46, %v240_v46  ;;  %v476_v55 = vsel %vm247_vm4, %v471_v52, 0 }
 0x481   :  { %v243_v38 = vpop.permute.xlu0 %242 }
 0x482   :  { %v249_v47 = vsel %vm247_vm4, %v243_v38, 0 }
 0x483   :  { %2126 = vmatpush3.bf16.msra.mxu0 %v249_v47  ;;  %v2336_v50 = vpop.eup %2335 }
 0x484   :  { %2137 = vmatprep.subr.bf16.mxu0 %v2389_v14  ;;  %v352_v51 = vmul.f32 %v2336_v50, %v2328_v31 }
 0x486   :  { %2128 = vmatmul.mubr.msk.bf16.vlgmr.msra.gmra.mxu0 %vm182_vm2, %v241_v49  ;;  %v353_v53 = vpack.c.bf16 %v352_v51, %v352_v51  ;;  %v2305_v49 = vld [vmem:[%s2904_s9] sm:$0xff]  }
 0x487   :  { %2138 = vmatpush3.bf16.msra.mxu0 %v360_v42  ;;  %2139 = vmatprep.mubr.msk.bf16.mxu0 %vm2390_vm1, %v2389_v14 }
 0x488   :  { %2149 = vmatprep.subr.bf16.mxu0 %v2389_v14 }
 0x48b   :  { %v2338_v54 = vpop.eup %2337 }
 0x48c   :  { %v468_v57 = vmul.f32 %v2338_v54, %v2330_v33 }
 0x48e   :  { %2140 = vmatmul.mubr.msk.bf16.vlgmr.msra.gmra.mxu0 %vm182_vm2, %v353_v53  ;;  %v469_v58 = vpack.c.bf16 %v468_v57, %v468_v57 }
 0x48f   :  { %2150 = vmatpush3.bf16.msra.mxu0 %v476_v55  ;;  %2151 = vmatprep.mubr.msk.bf16.mxu0 %vm2390_vm1, %v2389_v14 }
 0x490   :  { %2161 = vmatprep.subr.bf16.mxu0 %v2389_v14 }
 0x496   :  { %2152 = vmatmul.mubr.msk.bf16.vlgmr.msra.gmra.mxu0 %vm182_vm2, %v469_v58  ;;  %v1977_v58 = vld [vmem:[%s2905_s7] ss:$0 sm:$0xff] }
 0x497   :  { %2163 = vmatprep.mubr.msk.bf16.mxu0 %vm2390_vm1, %v2389_v14 }
 0x4ae   :  { %v577_v59 = vpop.xlane.xlu1 %576 }
 0x4af   :  { %2339 = vrcp.f32 %v577_v59 }
 0x4b2   :  { %v582_v60 = vpop.permute.xlu1 %581 }
 0x4b3   :  { %v587_v61 = vsel %vm247_vm4, %v582_v60, 0 }
 0x4b4   :  { %2162 = vmatpush3.bf16.msra.mxu0 %v587_v61 }
 0x4b5   :  { %2173 = vmatprep.subr.bf16.mxu0 %v2389_v14 }
 0x4bc   :  { %v2340_v62 = vpop.eup %2339 }
 0x4bd   :  { %v579_v63 = vmul.f32 %v2340_v62, %v2332_v39  ;;  %v1978_v62 = vld [vmem:[%s2906_s8] ss:$0 sm:$0xff] }
 0x4bf   :  { %v580_v2 = vpack.c.bf16 %v579_v63, %v579_v63 }
 0x4c1   :  { %2164 = vmatmul.mubr.msk.bf16.vlgmr.msra.gmra.mxu0 %vm182_vm2, %v580_v2 }
 0x4c2   :  { %2177 = vmatprep.mubr.msk.bf16.mxu0 %vm2390_vm1, %v2389_v14  ;;  %2174 = vmatpush3.bf16.msra.mxu0 %v2304_v48 }
 0x4c3   :  { %2175 = vmatprep.subr.bf16.mxu0 %v2389_v14 }
 0x4c6   :  { %2176 = vmatpush3.bf16.msra.mxu0 %v2305_v49 }
 0x4c7   :  { %2193 = vmatprep.subr.bf16.mxu0 %v2389_v14 }
 0x546   :  { %v285_v4 = vpop.f32.mrf.mxu0 }
 0x548   :  { %v2129_v5 = vpop.f32.mrf.mxu0 }
 0x549   :  { %v2306_v5 = vld [vmem:[%s2907_s11 + $0x18] sm:$0xff]  }
 0x54a   :  { %v288_v6 = vpop.f32.mrf.mxu0 }
 0x54b   :  { %v2307_v6 = vld [vmem:[%s2907_s11 + $0x10] sm:$0xff]  }
 0x54c   :  { %v2130_v7 = vpop.f32.mrf.mxu0 }
 0x54d   :  { %v2308_v7 = vld [vmem:[%s2907_s11 + $0x8] sm:$0xff]  }
 0x54e   :  { %v396_v8 = vpop.f32.mrf.mxu0 }
 0x550   :  { %v2141_v9 = vpop.f32.mrf.mxu0 }
 0x551   :  { %v1979_v9 = vld [vmem:[%s2908_s10] ss:$0 sm:$0xff] }
 0x552   :  { %v399_v10 = vpop.f32.mrf.mxu0 }
 0x554   :  { %v2142_v11 = vpop.f32.mrf.mxu0 }
 0x556   :  { %v512_v12 = vpop.f32.mrf.mxu0 }
 0x558   :  { %v2153_v13 = vpop.f32.mrf.mxu0 }
 0x55a   :  { %v515_v15 = vpop.f32.mrf.mxu0 }
 0x55c   :  { %v2154_v16 = vpop.f32.mrf.mxu0 }
 0x581   :  { %v623_v17 = vpop.f32.mrf.mxu0 }
 0x582   :  { %v2291_v18 = vpack.i.bf16 %v623_v17, %v396_v8  ;;  %v2309_v8 = vld [vmem:[%s2907_s11] sm:$0xff]  }
 0x583   :  { %v2165_v19 = vpop.f32.mrf.mxu0 }
 0x584   :  { %2292 = vrot.lane.b32.xlu0 %v2291_v18, %s2396_s19 }
 0x585   :  { %v626_v20 = vpop.f32.mrf.mxu0 }
 0x587   :  { %v2166_v21 = vpop.f32.mrf.mxu0 }
 0x5f6   :  { %v2293_v22 = vpop.permute.xlu0 %2292 }
 0x5f7   :  { %v2295_v23 = vunpack.i.h.bf16 %v2293_v22  ;;  %v2294_v24 = vunpack.i.l.bf16 %v2293_v22 }
 0x5f9   :  { %v633_v25 = vsel %vm182_vm2, %v512_v12, %v2295_v23  ;;  %v406_v26 = vsel %vm182_vm2, %v285_v4, %v2294_v24 }
 0x5fa   :  { %v634_v27 = vpack.c.bf16 %v633_v25, %v406_v26 }
 0x5fc   :  { %2170 = vmatmul.mubr.msk.bf16.vlgmr.msra.gmra.mxu1 %vm650_vm5, %v634_v27 }
 0x5fd   :  { %2189 = vmatprep.mubr.msk.bf16.mxu1 %vm2390_vm1, %v2389_v14  ;;  %2182 = vmatpush3.bf16.msra.mxu1 %v2306_v5 }
 0x5fe   :  { %2183 = vmatprep.subr.bf16.mxu1 %v2389_v14 }
 0x601   :  { %2184 = vmatpush3.bf16.msra.mxu1 %v2307_v6 }
 0x602   :  { %2185 = vmatprep.subr.bf16.mxu1 %v2389_v14 }
 0x605   :  { %2186 = vmatpush3.bf16.msra.mxu1 %v2308_v7  ;;  %v1983_v7 = vld [vmem:[%s2909_s12] ss:$0 sm:$0xff] }
 0x606   :  { %2187 = vmatprep.subr.bf16.mxu1 %v2389_v14 }
 0x609   :  { %2188 = vmatpush3.bf16.msra.mxu1 %v2309_v8 }
 0x60a   :  { %2207 = vmatprep.subr.bf16.mxu1 %v2389_v14 }
 0x6bc   :  { %v688_v29 = vpop.f32.mrf.mxu1 }
 0x6bd   :  { %v689_v30 = vadd.f32 %v1974_v28, %v688_v29 }
 0x6be   :  { %v2171_v31 = vpop.f32.mrf.mxu1 }
 0x6bf   :  { %v2631_v32 = vadd.f32 %v689_v30, %v2490_v0 }
 0x6c0   :  { %v691_v33 = vpop.f32.mrf.mxu1 }
 0x6c1   :  { %v692_v34 = vadd.f32 %v1974_v28, %v691_v33  ;;  %v699_v35 = vsel %vm66_vm0, %v2631_v32, 0.0 }
 0x6c2   :  { %700 = vadd.xlane.f32.xlu1 %v699_v35  ;;  %v2172_v36 = vpop.f32.mrf.mxu1 }
 0x6c3   :  { %v2636_v37 = vadd.f32 %v692_v34, %v2495_v1 }
 0x6c5   :  { %v702_v39 = vsel %vm66_vm0, %v2636_v37, 0.0 }
 0x6c6   :  { %703 = vadd.xlane.f32.xlu0 %v702_v39 }
 0x74b   :  { %v701_v40 = vpop.xlane.xlu1 %700 }
 0x74c   :  { %v705_v41 = vmul.f32 0.03125, %v701_v40 }
 0x74e   :  { %v707_v43 = vsub.f32 %v2631_v32, %v705_v41 }
 0x74f   :  { %v704_v0 = vpop.xlane.xlu0 %703 }
 0x750   :  { %v706_v44 = vmul.f32 0.03125, %v704_v0  ;;  %v709_v45 = vmul.f32 %v707_v43, %v707_v43 }
 0x752   :  { %v708_v46 = vsub.f32 %v2636_v37, %v706_v44  ;;  %v711_v38 = vsel %vm66_vm0, %v709_v45, 0.0 }
 0x753   :  { %712 = vadd.xlane.f32.xlu0 %v711_v38 }
 0x754   :  { %v710_v47 = vmul.f32 %v708_v46, %v708_v46 }
 0x756   :  { %v714_v1 = vsel %vm66_vm0, %v710_v47, 0.0 }
 0x757   :  { %715 = vadd.xlane.f32.xlu0 %v714_v1 }
 0x7dc   :  { %v713_v50 = vpop.xlane.xlu0 %712 }
 0x7dd   :  { %v717_v42 = vmul.f32 0.03125, %v713_v50 }
 0x7df   :  { %v719_v51 = vadd.f32 1e-05, %v717_v42 }
 0x7e0   :  { %v716_v52 = vpop.xlane.xlu0 %715 }
 0x7e1   :  { %2341 = vrsqrt.f32 %v719_v51  ;;  %v718_v53 = vmul.f32 0.03125, %v716_v52 }
 0x7e3   :  { %v720_v54 = vadd.f32 1e-05, %v718_v53 }
 0x7e5   :  { %2343 = vrsqrt.f32 %v720_v54 }
 0x7ee   :  { %v2342_v55 = vpop.eup %2341 }
 0x7ef   :  { %v723_v57 = vmul.f32 %v2342_v55, %v707_v43 }
 0x7f1   :  { %v731_v61 = vmul.f32 %v1977_v58, %v723_v57 }
 0x7f2   :  { %v2344_v59 = vpop.eup %2343 }
 0x7f3   :  { %v724_v60 = vmul.f32 %v2344_v59, %v708_v46  ;;  %v739_v2 = vadd.f32 %v1978_v62, %v731_v61 }
 0x7f5   :  { %v732_v63 = vmul.f32 %v1977_v58, %v724_v60 }
 0x7f7   :  { %v740_v3 = vadd.f32 %v1978_v62, %v732_v63 }
 0x7f9   :  { %v741_v4 = vpack.c.bf16 %v740_v3, %v739_v2 }
 0x7fb   :  { %2178 = vmatmul.mubr.msk.bf16.vlgmr.msra.gmra.mxu0 %vm66_vm0, %v741_v4 }
 0x7fc   :  { %2197 = vmatprep.mubr.msk.bf16.mxu0 %vm2390_vm1, %v2389_v14 }
 0x8bb   :  { %v802_v10 = vpop.f32.mrf.mxu0 }
 0x8bc   :  { %v803_v11 = vadd.f32 %v1979_v9, %v802_v10 }
 0x8bd   :  { %v2179_v12 = vpop.f32.mrf.mxu0 }
 0x8be   :  { %v811_v13 = vmul.f32 0.70710677, %v803_v11  ;;  %v809_v63 = vmul.f32 0.5, %v803_v11 }
 0x8bf   :  { %v805_v15 = vpop.f32.mrf.mxu0 }
 0x8c0   :  { %v813_v16 = vand.u32 2147483647, %v811_v13  ;;  %v806_v17 = vadd.f32 %v1979_v9, %v805_v15  ;;  %vm853_vm6 = vcmp.lt.f32.partialorder %v811_v13, 0.0 }
 0x8c1   :  { %v2180_v18 = vpop.f32.mrf.mxu0 }
 0x8c2   :  { %v815_v19 = vmul.f32 0.3275911, %v813_v16  ;;  %v812_v20 = vmul.f32 0.70710677, %v806_v17  ;;  %v841_v25 = vsub.f32 0.0, %v813_v16  ;;  %v810_v2 = vmul.f32 0.5, %v806_v17 }
 0x8c4   :  { %v817_v21 = vadd.f32 1.0, %v815_v19  ;;  %v814_v22 = vand.u32 2147483647, %v812_v20  ;;  %v843_v26 = vmul.f32 %v841_v25, %v813_v16  ;;  %vm854_vm7 = vcmp.lt.f32.partialorder %v812_v20, 0.0 }
 0x8c6   :  { %2345 = vrcp.f32 %v817_v21  ;;  %v816_v23 = vmul.f32 0.3275911, %v814_v22  ;;  %v842_v27 = vsub.f32 0.0, %v814_v22  ;;  %v845_v30 = vmul.f32 1.442695, %v843_v26 }
 0x8c8   :  { %v818_v24 = vadd.f32 1.0, %v816_v23  ;;  %v844_v31 = vmul.f32 %v842_v27, %v814_v22  ;;  %v2310_v27 = vld [vmem:[%s2920_s30 + $0x18] sm:$0xff]  }
 0x8c9   :  { %2194 = vmatpush3.bf16.msra.mxu0 %v2310_v27 }
 0x8ca   :  { %2347 = vrcp.f32 %v818_v24  ;;  %v847_v39 = vmul.f32 1.442695, %v844_v31  ;;  %2195 = vmatprep.subr.bf16.mxu0 %v2389_v14 }
 0x8cb   :  { %2349 = vpow2.f32 %v845_v30 }
 0x8cc   :  { %2351 = vpow2.f32 %v847_v39  ;;  %v1991_v39 = vld [vmem:[%s2899_s1 + $0x1] ss:$0 sm:$0xff] }
 0x8d3   :  { %v2346_v28 = vpop.eup %2345 }
 0x8d4   :  { %v823_v29 = vmul.f32 1.0614054, %v2346_v28 }
 0x8d6   :  { %v825_v33 = vadd.f32 -1.4531521, %v823_v29 }
 0x8d7   :  { %v2348_v34 = vpop.eup %2347 }
 0x8d8   :  { %v827_v35 = vmul.f32 %v2346_v28, %v825_v33  ;;  %v824_v36 = vmul.f32 1.0614054, %v2348_v34  ;;  %v2350_v50 = vpop.eup %2349 }
 0x8d9   :  { %v2352_v54 = vpop.eup %2351 }
 0x8da   :  { %v829_v40 = vadd.f32 1.4214138, %v827_v35  ;;  %v826_v41 = vadd.f32 -1.4531521, %v824_v36 }
 0x8dc   :  { %v831_v43 = vmul.f32 %v2346_v28, %v829_v40  ;;  %v828_v0 = vmul.f32 %v2348_v34, %v826_v41  ;;  %v1992_v41 = vld [vmem:[%s2900_s2 + $0x1] ss:$0 sm:$0xff] }
 0x8de   :  { %v833_v44 = vadd.f32 -0.28449672, %v831_v43  ;;  %v830_v45 = vadd.f32 1.4214138, %v828_v0 }
 0x8e0   :  { %v835_v46 = vmul.f32 %v2346_v28, %v833_v44  ;;  %v832_v38 = vmul.f32 %v2348_v34, %v830_v45 }
 0x8e2   :  { %v837_v47 = vadd.f32 0.2548296, %v835_v46  ;;  %v834_v1 = vadd.f32 -0.28449672, %v832_v38 }
 0x8e4   :  { %v839_v48 = vmul.f32 %v2346_v28, %v837_v47  ;;  %v836_v49 = vmul.f32 %v2348_v34, %v834_v1  ;;  %v2311_v28 = vld [vmem:[%s2920_s30 + $0x10] sm:$0xff]   ;;  %v1998_v1 = vld [vmem:[%s2901_s4 + $0x1] ss:$0 sm:$0xff] }
 0x8e5   :  { %2196 = vmatpush3.bf16.msra.mxu0 %v2311_v28 }
 0x8e6   :  { %v849_v42 = vmul.f32 %v2350_v50, %v839_v48  ;;  %v838_v51 = vadd.f32 0.2548296, %v836_v49  ;;  %2201 = vmatprep.subr.bf16.mxu0 %v2389_v14 }
 0x8e8   :  { %v851_v52 = vsub.f32 1.0, %v849_v42  ;;  %v840_v53 = vmul.f32 %v2348_v34, %v838_v51 }
 0x8ea   :  { %v855_v55 = vsub.f32 0.0, %v851_v52  ;;  %v850_v57 = vmul.f32 %v2352_v54, %v840_v53 }
 0x8ec   :  { %v857_v58 = vsel %vm853_vm6, %v855_v55, %v851_v52  ;;  %v852_v59 = vsub.f32 1.0, %v850_v57 }
 0x8ed   :  { %v859_v61 = vadd.f32 1.0, %v857_v58 }
 0x8ee   :  { %v856_v60 = vsub.f32 0.0, %v852_v59 }
 0x8ef   :  { %v861_v4 = vmul.f32 %v859_v61, %v809_v63 }
 0x8f0   :  { %v858_v62 = vsel %vm854_vm7, %v856_v60, %v852_v59 }
 0x8f1   :  { %v860_v3 = vadd.f32 1.0, %v858_v62 }
 0x8f3   :  { %v862_v5 = vmul.f32 %v860_v3, %v810_v2 }
 0x8f5   :  { %v863_v6 = vpack.c.bf16 %v862_v5, %v861_v4 }
 0x8f7   :  { %2190 = vmatmul.mubr.msk.bf16.vlgmr.msra.gmra.mxu1 %vm903_vm8, %v863_v6 }
 0x8f8   :  { %2209 = vmatprep.mubr.msk.bf16.mxu1 %vm2390_vm1, %v2389_v14 }
 0x9b7   :  { %v941_v8 = vpop.f32.mrf.mxu1 }
 0x9b8   :  { %v942_v9 = vadd.f32 %v1983_v7, %v941_v8 }
 0x9b9   :  { %v2191_v10 = vpop.f32.mrf.mxu1 }
 0x9ba   :  { %v2687_v11 = vadd.f32 %v942_v9, %v2631_v32 }
 0x9bb   :  { %v944_v12 = vpop.f32.mrf.mxu1 }
 0x9bc   :  { %v945_v13 = vadd.f32 %v1983_v7, %v944_v12  ;;  %v954_v15 = vsel %vm66_vm0, %v2687_v11, 0.0 }
 0x9bd   :  { %955 = vadd.xlane.f32.xlu1 %v954_v15  ;;  %v2192_v16 = vpop.f32.mrf.mxu1 }
 0x9be   :  { %v2692_v17 = vadd.f32 %v945_v13, %v2636_v37 }
 0x9c0   :  { %v957_v18 = vsel %vm66_vm0, %v2692_v17, 0.0 }
 0x9c1   :  { %958 = vadd.xlane.f32.xlu0 %v957_v18 }
 0xa46   :  { %v956_v19 = vpop.xlane.xlu1 %955 }
 0xa47   :  { %v960_v20 = vmul.f32 0.03125, %v956_v19 }
 0xa49   :  { %v962_v21 = vsub.f32 %v2687_v11, %v960_v20 }
 0xa4a   :  { %v959_v32 = vpop.xlane.xlu0 %958 }
 0xa4b   :  { %v961_v22 = vmul.f32 0.03125, %v959_v32  ;;  %v964_v23 = vmul.f32 %v962_v21, %v962_v21 }
 0xa4d   :  { %v963_v24 = vsub.f32 %v2692_v17, %v961_v22  ;;  %v966_v25 = vsel %vm66_vm0, %v964_v23, 0.0 }
 0xa4e   :  { %967 = vadd.xlane.f32.xlu1 %v966_v25 }
 0xa4f   :  { %v965_v26 = vmul.f32 %v963_v24, %v963_v24 }
 0xa51   :  { %v969_v37 = vsel %vm66_vm0, %v965_v26, 0.0 }
 0xa52   :  { %970 = vadd.xlane.f32.xlu0 %v969_v37 }
 0xad7   :  { %v968_v29 = vpop.xlane.xlu1 %967 }
 0xad8   :  { %v972_v30 = vmul.f32 0.03125, %v968_v29 }
 0xada   :  { %v974_v31 = vadd.f32 1e-05, %v972_v30 }
 0xadb   :  { %v971_v33 = vpop.xlane.xlu0 %970 }
 0xadc   :  { %2353 = vrsqrt.f32 %v974_v31  ;;  %v973_v34 = vmul.f32 0.03125, %v971_v33 }
 0xade   :  { %v975_v35 = vadd.f32 1e-05, %v973_v34 }
 0xae0   :  { %2355 = vrsqrt.f32 %v975_v35 }
 0xae9   :  { %v2354_v36 = vpop.eup %2353 }
 0xaea   :  { %v978_v40 = vmul.f32 %v2354_v36, %v962_v21 }
 0xaec   :  { %v986_v43 = vmul.f32 %v1991_v39, %v978_v40 }
 0xaed   :  { %v2356_v0 = vpop.eup %2355 }
 0xaee   :  { %v979_v44 = vmul.f32 %v2356_v0, %v963_v24  ;;  %v994_v45 = vadd.f32 %v1992_v41, %v986_v43 }
 0xaf0   :  { %v987_v46 = vmul.f32 %v1991_v39, %v979_v44 }
 0xaf2   :  { %v995_v38 = vadd.f32 %v1992_v41, %v987_v46 }
 0xaf4   :  { %v996_v47 = vpack.c.bf16 %v995_v38, %v994_v45 }
 0xaf6   :  { %2198 = vmatmul.mubr.msk.bf16.vlgmr.msra.gmra.mxu0 %vm66_vm0, %v996_v47 }
 0xaf7   :  { %2203 = vmatprep.mubr.msk.bf16.mxu0 %vm2390_vm1, %v2389_v14 }
 0xbb6   :  { %v1059_v48 = vpop.f32.mrf.mxu0 }
 0xbb7   :  { %v1060_v49 = vadd.f32 %v1998_v1, %v1059_v48 }
 0xbb8   :  { %v2199_v50 = vpop.f32.mrf.mxu0 }
 0xbb9   :  { %v2720_v42 = vpack.c.bf16 %v1060_v49, %v1060_v49 }
 0xbba   :  { %v1062_v51 = vpop.f32.mrf.mxu0 }
 0xbbb   :  { %v1063_v52 = vadd.f32 %v1998_v1, %v1062_v51  ;;  %1179 = vrot.lane.b32.xlu0 %v2720_v42, %s2391_s25  ;;  %1068 = vrot.lane.b32.xlu1 %v2720_v42, %s2392_s26 }
 0xbbc   :  { %v2200_v53 = vpop.f32.mrf.mxu0 }
 0xbbd   :  { %v2726_v54 = vpack.c.bf16 %v1063_v52, %v1063_v52 }
 0xbbf   :  { %1177 = vrot.lane.b32.xlu1 %v2720_v42, %s2393_s27  ;;  %1404 = vrot.lane.b32.xlu0 %v2726_v54, %s2393_s27 }
 0xbc3   :  { %1295 = vrot.lane.b32.xlu1 %v2726_v54, %s2392_s26 }
 0xbc7   :  { %1406 = vrot.lane.b32.xlu1 %v2726_v54, %s2391_s25 }
 0xc2d   :  { %v1069_v55 = vpop.permute.xlu1 %1068  ;;  %v1180_v58 = vpop.permute.xlu0 %1179 }
 0xc2e   :  { %v1074_v57 = vsel %vm182_vm2, %v1069_v55, 0  ;;  %v1185_v60 = vsel %vm182_vm2, %v1180_v58, 0 }
 0xc2f   :  { %2202 = vmatpush3.bf16.xpose.msra.mxu0 %v1074_v57 }
 0xc30   :  { %2213 = vmatprep.subr.bf16.mxu0 %v2389_v14 }
 0xc31   :  { %v1178_v59 = vpop.permute.xlu1 %1177  ;;  %v1405_v3 = vpop.permute.xlu0 %1404 }
 0xc35   :  { %v1296_v61 = vpop.permute.xlu1 %1295 }
 0xc36   :  { %2204 = vmatmul.mubr.msk.bf16.vlgmr.msra.gmra.mxu0 %vm182_vm2, %v2720_v42  ;;  %v1301_v62 = vsel %vm182_vm2, %v1296_v61, 0 }
 0xc37   :  { %2214 = vmatpush3.bf16.xpose.msra.mxu0 %v1185_v60  ;;  %2215 = vmatprep.mubr.msk.bf16.mxu0 %vm2390_vm1, %v2389_v14 }
 0xc38   :  { %2225 = vmatprep.subr.bf16.mxu0 %v2389_v14 }
 0xc39   :  { %v1407_v63 = vpop.permute.xlu1 %1406 }
 0xc3a   :  { %v1412_v2 = vsel %vm182_vm2, %v1407_v63, 0 }
 0xc3e   :  { %2216 = vmatmul.mubr.msk.bf16.vlgmr.msra.gmra.mxu0 %vm182_vm2, %v1178_v59 }
 0xc3f   :  { %2226 = vmatpush3.bf16.xpose.msra.mxu0 %v1301_v62  ;;  %2227 = vmatprep.mubr.msk.bf16.mxu0 %vm2390_vm1, %v2389_v14 }
 0xc40   :  { %2237 = vmatprep.subr.bf16.mxu0 %v2389_v14 }
 0xc46   :  { %2228 = vmatmul.mubr.msk.bf16.vlgmr.msra.gmra.mxu0 %vm182_vm2, %v2726_v54 }
 0xc47   :  { %2238 = vmatpush3.bf16.xpose.msra.mxu0 %v1412_v2  ;;  %2239 = vmatprep.mubr.msk.bf16.mxu0 %vm2390_vm1, %v2389_v14 }
 0xc48   :  { %2249 = vmatprep.subr.bf16.mxu0 %v2389_v14 }
 0xc4e   :  { %2240 = vmatmul.mubr.msk.bf16.vlgmr.msra.gmra.mxu0 %vm182_vm2, %v1405_v3 }
 0xc4f   :  { %2251 = vmatprep.mubr.msk.bf16.mxu0 %vm2390_vm1, %v2389_v14 }
 0xcf6   :  { %v1110_v4 = vpop.f32.mrf.mxu0 }
 0xcf7   :  { %v1116_v5 = vsel %vm2569_vm3, %v1110_v4, -1e+30 }
 0xcf8   :  { %v2205_v6 = vpop.f32.mrf.mxu0  ;;  %v1117_v7 = vsel %vm182_vm2, %v1116_v5, -inf }
 0xcf9   :  { %1118 = vmax.xlane.f32.xlu1 %v1117_v7 }
 0xcfa   :  { %v1113_v8 = vpop.f32.mrf.mxu0 }
 0xcfc   :  { %v2206_v9 = vpop.f32.mrf.mxu0 }
 0xcfe   :  { %v1221_v10 = vpop.f32.mrf.mxu0 }
 0xcff   :  { %v1227_v12 = vsel %vm2569_vm3, %v1221_v10, -1e+30 }
 0xd00   :  { %v2217_v13 = vpop.f32.mrf.mxu0  ;;  %v1228_v15 = vsel %vm182_vm2, %v1227_v12, -inf }
 0xd01   :  { %1229 = vmax.xlane.f32.xlu0 %v1228_v15 }
 0xd02   :  { %v1224_v16 = vpop.f32.mrf.mxu0 }
 0xd04   :  { %v2218_v18 = vpop.f32.mrf.mxu0 }
 0xd06   :  { %v1337_v19 = vpop.f32.mrf.mxu0 }
 0xd07   :  { %v1343_v20 = vsel %vm2569_vm3, %v1337_v19, -1e+30 }
 0xd08   :  { %v2229_v21 = vpop.f32.mrf.mxu0  ;;  %v1344_v32 = vsel %vm182_vm2, %v1343_v20, -inf }
 0xd09   :  { %1345 = vmax.xlane.f32.xlu0 %v1344_v32 }
 0xd0a   :  { %v1340_v22 = vpop.f32.mrf.mxu0 }
 0xd0c   :  { %v2230_v23 = vpop.f32.mrf.mxu0 }
 0xd0e   :  { %v1448_v24 = vpop.f32.mrf.mxu0 }
 0xd0f   :  { %v1454_v25 = vsel %vm2569_vm3, %v1448_v24, -1e+30 }
 0xd10   :  { %v2241_v26 = vpop.f32.mrf.mxu0  ;;  %v1455_v37 = vsel %vm182_vm2, %v1454_v25, -inf }
 0xd11   :  { %1456 = vmax.xlane.f32.xlu0 %v1455_v37 }
 0xd12   :  { %v1451_v27 = vpop.f32.mrf.mxu0 }
 0xd14   :  { %v2242_v28 = vpop.f32.mrf.mxu0 }
 0xd82   :  { %v1119_v29 = vpop.xlane.xlu1 %1118 }
 0xd83   :  { %v1120_v30 = vsub.f32 %v1116_v5, %v1119_v29 }
 0xd85   :  { %v1121_v31 = vmul.f32 1.442695, %v1120_v30 }
 0xd87   :  { %2357 = vpow2.f32 %v1121_v31 }
 0xd8a   :  { %v1230_v33 = vpop.xlane.xlu0 %1229 }
 0xd8b   :  { %v1231_v34 = vsub.f32 %v1227_v12, %v1230_v33  ;;  %v2312_v12 = vld [vmem:[%s2902_s5 + $0x8] sm:$0xff]  }
 0xd8c   :  { %2250 = vmatpush3.bf16.msra.mxu0 %v2312_v12 }
 0xd8d   :  { %v1232_v35 = vmul.f32 1.442695, %v1231_v34  ;;  %2263 = vmatprep.subr.bf16.mxu0 %v2389_v14 }
 0xd8f   :  { %2359 = vpow2.f32 %v1232_v35 }
 0xd92   :  { %v1346_v40 = vpop.xlane.xlu0 %1345 }
 0xd93   :  { %v1347_v38 = vsub.f32 %v1343_v20, %v1346_v40 }
 0xd94   :  { %v2358_v36 = vpop.eup %2357 }
 0xd95   :  { %v1123_v39 = vsel %vm182_vm2, %v2358_v36, 0.0  ;;  %v1348_v47 = vmul.f32 1.442695, %v1347_v38 }
 0xd96   :  { %1124 = vadd.xlane.f32.xlu1 %v1123_v39  ;;  %v2013_v39 = vld [vmem:[%s2903_s6 + $0x1] ss:$0 sm:$0xff] }
 0xd9a   :  { %v1457_v56 = vpop.xlane.xlu0 %1456 }
 0xd9b   :  { %v1458_v41 = vsub.f32 %v1454_v25, %v1457_v56 }
 0xd9c   :  { %v2360_v43 = vpop.eup %2359 }
 0xd9d   :  { %v1459_v0 = vmul.f32 1.442695, %v1458_v41  ;;  %v1234_v44 = vsel %vm182_vm2, %v2360_v43, 0.0 }
 0xd9e   :  { %1235 = vadd.xlane.f32.xlu0 %v1234_v44 }
 0xd9f   :  { %2361 = vpow2.f32 %v1459_v0 }
 0xda0   :  { %2363 = vpow2.f32 %v1348_v47 }
 0xda7   :  { %1129 = vrot.lane.b32.xlu1 %v2720_v42, %s2395_s29 }
 0xdac   :  { %v2362_v45 = vpop.eup %2361 }
 0xdad   :  { %v1461_v46 = vsel %vm182_vm2, %v2362_v45, 0.0  ;;  %v2364_v1 = vpop.eup %2363 }
 0xdae   :  { %1462 = vadd.xlane.f32.xlu0 %v1461_v46  ;;  %v1350_v48 = vsel %vm182_vm2, %v2364_v1, 0.0 }
 0xdc4   :  { %1240 = vrot.lane.b32.xlu0 %v2720_v42, %s2394_s28 }
 0xdcb   :  { %1351 = vadd.xlane.f32.xlu1 %v1350_v48 }
 0xddc   :  { %1356 = vrot.lane.b32.xlu1 %v2726_v54, %s2395_s29 }
 0xde0   :  { %1467 = vrot.lane.b32.xlu1 %v2726_v54, %s2394_s28 }
 0xe1f   :  { %v1125_v49 = vpop.xlane.xlu1 %1124 }
 0xe20   :  { %2365 = vrcp.f32 %v1125_v49 }
 0xe23   :  { %v1130_v50 = vpop.permute.xlu1 %1129 }
 0xe24   :  { %v1135_v51 = vsel %vm247_vm4, %v1130_v50, 0 }
 0xe25   :  { %2208 = vmatpush3.bf16.msra.mxu1 %v1135_v51 }
 0xe26   :  { %2219 = vmatprep.subr.bf16.mxu1 %v2389_v14 }
 0xe27   :  { %v1236_v52 = vpop.xlane.xlu0 %1235 }
 0xe28   :  { %2367 = vrcp.f32 %v1236_v52 }
 0xe2d   :  { %v2366_v42 = vpop.eup %2365 }
 0xe2e   :  { %v1127_v53 = vmul.f32 %v2366_v42, %v2358_v36 }
 0xe30   :  { %v1128_v55 = vpack.c.bf16 %v1127_v53, %v1127_v53 }
 0xe32   :  { %2210 = vmatmul.mubr.msk.bf16.vlgmr.msra.gmra.mxu1 %vm182_vm2, %v1128_v55  ;;  %v2313_v55 = vld [vmem:[%s2904_s9 + $0x18] sm:$0xff]  }
 0xe33   :  { %2221 = vmatprep.mubr.msk.bf16.mxu1 %vm2390_vm1, %v2389_v14 }
 0xe35   :  { %v2368_v57 = vpop.eup %2367 }
 0xe36   :  { %v1238_v58 = vmul.f32 %v2368_v57, %v2360_v43  ;;  %v2314_v57 = vld [vmem:[%s2904_s9 + $0x10] sm:$0xff]  }
 0xe37   :  { %v1463_v54 = vpop.xlane.xlu0 %1462 }
 0xe38   :  { %v1239_v61 = vpack.c.bf16 %v1238_v58, %v1238_v58 }
 0xe3b   :  { %v1241_v59 = vpop.permute.xlu0 %1240 }
 0xe3c   :  { %v1246_v60 = vsel %vm247_vm4, %v1241_v59, 0 }
 0xe3d   :  { %2220 = vmatpush3.bf16.msra.mxu1 %v1246_v60 }
 0xe3e   :  { %2231 = vmatprep.subr.bf16.mxu1 %v2389_v14 }
 0xe40   :  { %2222 = vmatmul.mubr.msk.bf16.vlgmr.msra.gmra.mxu1 %vm182_vm2, %v1239_v61 }
 0xe41   :  { %2233 = vmatprep.mubr.msk.bf16.mxu1 %vm2390_vm1, %v2389_v14 }
 0xe54   :  { %v1352_v62 = vpop.xlane.xlu1 %1351 }
 0xe55   :  { %2369 = vrcp.f32 %v1352_v62 }
 0xe56   :  { %2371 = vrcp.f32 %v1463_v54 }
 0xe58   :  { %v1357_v63 = vpop.permute.xlu1 %1356 }
 0xe59   :  { %v1362_v2 = vsel %vm247_vm4, %v1357_v63, 0 }
 0xe5a   :  { %2232 = vmatpush3.bf16.msra.mxu1 %v1362_v2 }
 0xe5b   :  { %2243 = vmatprep.subr.bf16.mxu1 %v2389_v14 }
 0xe5c   :  { %v1468_v5 = vpop.permute.xlu1 %1467 }
 0xe5d   :  { %v1473_v8 = vsel %vm247_vm4, %v1468_v5, 0 }
 0xe62   :  { %v2370_v3 = vpop.eup %2369 }
 0xe63   :  { %v1354_v4 = vmul.f32 %v2370_v3, %v2364_v1  ;;  %v2372_v7 = vpop.eup %2371  ;;  %v2018_v3 = vld [vmem:[%s2905_s7 + $0x1] ss:$0 sm:$0xff] }
 0xe64   :  { %v1465_v9 = vmul.f32 %v2372_v7, %v2362_v45  ;;  %v2019_v7 = vld [vmem:[%s2906_s8 + $0x1] ss:$0 sm:$0xff] }
 0xe65   :  { %v1355_v6 = vpack.c.bf16 %v1354_v4, %v1354_v4 }
 0xe66   :  { %v1466_v10 = vpack.c.bf16 %v1465_v9, %v1465_v9 }
 0xe67   :  { %2234 = vmatmul.mubr.msk.bf16.vlgmr.msra.gmra.mxu1 %vm182_vm2, %v1355_v6 }
 0xe68   :  { %2244 = vmatpush3.bf16.msra.mxu1 %v1473_v8  ;;  %2245 = vmatprep.mubr.msk.bf16.mxu1 %vm2390_vm1, %v2389_v14 }
 0xe69   :  { %2255 = vmatprep.subr.bf16.mxu1 %v2389_v14 }
 0xe6f   :  { %2246 = vmatmul.mubr.msk.bf16.vlgmr.msra.gmra.mxu1 %vm182_vm2, %v1466_v10 }
 0xe70   :  { %2259 = vmatprep.mubr.msk.bf16.mxu1 %vm2390_vm1, %v2389_v14  ;;  %2256 = vmatpush3.bf16.msra.mxu1 %v2313_v55 }
 0xe71   :  { %2257 = vmatprep.subr.bf16.mxu1 %v2389_v14 }
 0xe74   :  { %2258 = vmatpush3.bf16.msra.mxu1 %v2314_v57 }
 0xe75   :  { %2275 = vmatprep.subr.bf16.mxu1 %v2389_v14 }
 0xef2   :  { %v1171_v13 = vpop.f32.mrf.mxu1 }
 0xef4   :  { %v2211_v15 = vpop.f32.mrf.mxu1 }
 0xef5   :  { %v2316_v15 = vld [vmem:[%s2907_s11 + $0x30] sm:$0xff]  }
 0xef6   :  { %v1174_v16 = vpop.f32.mrf.mxu1 }
 0xef7   :  { %v2317_v16 = vld [vmem:[%s2907_s11 + $0x28] sm:$0xff]  }
 0xef8   :  { %v2212_v18 = vpop.f32.mrf.mxu1 }
 0xef9   :  { %v2318_v18 = vld [vmem:[%s2907_s11 + $0x20] sm:$0xff]  }
 0xf00   :  { %v1282_v19 = vpop.f32.mrf.mxu1 }
 0xf02   :  { %v2223_v20 = vpop.f32.mrf.mxu1 }
 0xf04   :  { %v1285_v21 = vpop.f32.mrf.mxu1 }
 0xf06   :  { %v2224_v32 = vpop.f32.mrf.mxu1 }
 0xf27   :  { %v1398_v22 = vpop.f32.mrf.mxu1 }
 0xf29   :  { %v2235_v23 = vpop.f32.mrf.mxu1 }
 0xf2b   :  { %v1401_v24 = vpop.f32.mrf.mxu1 }
 0xf2d   :  { %v2236_v25 = vpop.f32.mrf.mxu1 }
 0xf2f   :  { %v1509_v26 = vpop.f32.mrf.mxu1 }
 0xf30   :  { %v2296_v37 = vpack.i.bf16 %v1509_v26, %v1282_v19  ;;  %v2025_v19 = vld [vmem:[%s2908_s10 + $0x1] ss:$0 sm:$0xff] }
 0xf31   :  { %v2247_v27 = vpop.f32.mrf.mxu1 }
 0xf32   :  { %2297 = vrot.lane.b32.xlu1 %v2296_v37, %s2396_s19 }
 0xf33   :  { %v1512_v28 = vpop.f32.mrf.mxu1 }
 0xf35   :  { %v2248_v29 = vpop.f32.mrf.mxu1 }
 0xfa4   :  { %v2298_v30 = vpop.permute.xlu1 %2297 }
 0xfa5   :  { %v2300_v31 = vunpack.i.h.bf16 %v2298_v30  ;;  %v2299_v33 = vunpack.i.l.bf16 %v2298_v30 }
 0xfa7   :  { %v1519_v34 = vsel %vm182_vm2, %v1398_v22, %v2300_v31  ;;  %v1292_v35 = vsel %vm182_vm2, %v1171_v13, %v2299_v33  ;;  %v2315_v13 = vld [vmem:[%s2907_s11 + $0x38] sm:$0xff]  }
 0xfa8   :  { %v1520_v36 = vpack.c.bf16 %v1519_v34, %v1292_v35 }
 0xfaa   :  { %2252 = vmatmul.mubr.msk.bf16.vlgmr.msra.gmra.mxu0 %vm650_vm5, %v1520_v36 }
 0xfab   :  { %2271 = vmatprep.mubr.msk.bf16.mxu0 %vm2390_vm1, %v2389_v14  ;;  %2264 = vmatpush3.bf16.msra.mxu0 %v2315_v13 }
 0xfac   :  { %2265 = vmatprep.subr.bf16.mxu0 %v2389_v14 }
 0xfaf   :  { %2266 = vmatpush3.bf16.msra.mxu0 %v2316_v15  ;;  %v2038_v15 = vld [vmem:[%s2909_s12 + $0x1] ss:$0 sm:$0xff] }
 0xfb0   :  { %2267 = vmatprep.subr.bf16.mxu0 %v2389_v14 }
 0xfb3   :  { %2268 = vmatpush3.bf16.msra.mxu0 %v2317_v16 }
 0xfb4   :  { %2269 = vmatprep.subr.bf16.mxu0 %v2389_v14 }
 0xfb7   :  { %2270 = vmatpush3.bf16.msra.mxu0 %v2318_v18 }
0x106a   :  { %v1575_v40 = vpop.f32.mrf.mxu0 }
0x106b   :  { %v1576_v56 = vadd.f32 %v2013_v39, %v1575_v40 }
0x106c   :  { %v2253_v41 = vpop.f32.mrf.mxu0 }
0x106d   :  { %v2816_v43 = vadd.f32 %v1576_v56, %v2687_v11 }
0x106e   :  { %v1578_v0 = vpop.f32.mrf.mxu0 }
0x106f   :  { %v1579_v44 = vadd.f32 %v2013_v39, %v1578_v0  ;;  %v1588_v45 = vsel %vm66_vm0, %v2816_v43, 0.0 }
0x1070   :  { %1589 = vadd.xlane.f32.xlu0 %v1588_v45  ;;  %v2254_v46 = vpop.f32.mrf.mxu0 }
0x1071   :  { %v2821_v38 = vadd.f32 %v1579_v44, %v2692_v17 }
0x1073   :  { %v1591_v47 = vsel %vm66_vm0, %v2821_v38, 0.0 }
0x1074   :  { %1592 = vadd.xlane.f32.xlu1 %v1591_v47 }
0x10f9   :  { %v1590_v1 = vpop.xlane.xlu0 %1589 }
0x10fa   :  { %v1594_v48 = vmul.f32 0.03125, %v1590_v1 }
0x10fc   :  { %v1596_v49 = vsub.f32 %v2816_v43, %v1594_v48 }
0x10fd   :  { %v1593_v11 = vpop.xlane.xlu1 %1592 }
0x10fe   :  { %v1595_v50 = vmul.f32 0.03125, %v1593_v11  ;;  %v1598_v51 = vmul.f32 %v1596_v49, %v1596_v49 }
0x1100   :  { %v1597_v52 = vsub.f32 %v2821_v38, %v1595_v50  ;;  %v1600_v42 = vsel %vm66_vm0, %v1598_v51, 0.0 }
0x1101   :  { %1601 = vadd.xlane.f32.xlu0 %v1600_v42 }
0x1102   :  { %v1599_v53 = vmul.f32 %v1597_v52, %v1597_v52 }
0x1104   :  { %v1603_v17 = vsel %vm66_vm0, %v1599_v53, 0.0 }
0x1105   :  { %1604 = vadd.xlane.f32.xlu0 %v1603_v17 }
0x118a   :  { %v1602_v54 = vpop.xlane.xlu0 %1601 }
0x118b   :  { %v1606_v58 = vmul.f32 0.03125, %v1602_v54 }
0x118d   :  { %v1608_v59 = vadd.f32 1e-05, %v1606_v58 }
0x118e   :  { %v1605_v60 = vpop.xlane.xlu0 %1604 }
0x118f   :  { %2373 = vrsqrt.f32 %v1608_v59  ;;  %v1607_v61 = vmul.f32 0.03125, %v1605_v60 }
0x1191   :  { %v1609_v62 = vadd.f32 1e-05, %v1607_v61 }
0x1193   :  { %2375 = vrsqrt.f32 %v1609_v62 }
0x119c   :  { %v2374_v63 = vpop.eup %2373 }
0x119d   :  { %v1612_v2 = vmul.f32 %v2374_v63, %v1596_v49 }
0x119f   :  { %v1620_v6 = vmul.f32 %v2018_v3, %v1612_v2 }
0x11a0   :  { %v2376_v4 = vpop.eup %2375 }
0x11a1   :  { %v1613_v5 = vmul.f32 %v2376_v4, %v1597_v52  ;;  %v1628_v9 = vadd.f32 %v2019_v7, %v1620_v6 }
0x11a3   :  { %v1621_v8 = vmul.f32 %v2018_v3, %v1613_v5 }
0x11a5   :  { %v1629_v10 = vadd.f32 %v2019_v7, %v1621_v8 }
0x11a7   :  { %v1630_v12 = vpack.c.bf16 %v1629_v10, %v1628_v9 }
0x11a9   :  { %2260 = vmatmul.mubr.msk.bf16.vlgmr.msra.gmra.mxu1 %vm66_vm0, %v1630_v12 }
0x11aa   :  { %2279 = vmatprep.mubr.msk.bf16.mxu1 %vm2390_vm1, %v2389_v14 }
0x1269   :  { %v1693_v20 = vpop.f32.mrf.mxu1 }
0x126a   :  { %v1694_v21 = vadd.f32 %v2025_v19, %v1693_v20 }
0x126b   :  { %v2261_v32 = vpop.f32.mrf.mxu1 }
0x126c   :  { %v1702_v22 = vmul.f32 0.70710677, %v1694_v21  ;;  %v1700_v7 = vmul.f32 0.5, %v1694_v21 }
0x126d   :  { %v1696_v23 = vpop.f32.mrf.mxu1 }
0x126e   :  { %v1704_v24 = vand.u32 2147483647, %v1702_v22  ;;  %v1697_v25 = vadd.f32 %v2025_v19, %v1696_v23  ;;  %vm1744_vm9 = vcmp.lt.f32.partialorder %v1702_v22, 0.0 }
0x126f   :  { %v2262_v26 = vpop.f32.mrf.mxu1 }
0x1270   :  { %v1706_v37 = vmul.f32 0.3275911, %v1704_v24  ;;  %v1703_v27 = vmul.f32 0.70710677, %v1697_v25  ;;  %v1732_v33 = vsub.f32 0.0, %v1704_v24  ;;  %v1701_v8 = vmul.f32 0.5, %v1697_v25 }
0x1272   :  { %v1708_v28 = vadd.f32 1.0, %v1706_v37  ;;  %v1705_v29 = vand.u32 2147483647, %v1703_v27  ;;  %v1734_v34 = vmul.f32 %v1732_v33, %v1704_v24  ;;  %vm1745_vm10 = vcmp.lt.f32.partialorder %v1703_v27, 0.0 }
0x1274   :  { %2377 = vrcp.f32 %v1708_v28  ;;  %v1707_v30 = vmul.f32 0.3275911, %v1705_v29  ;;  %v1733_v35 = vsub.f32 0.0, %v1705_v29  ;;  %v1736_v40 = vmul.f32 1.442695, %v1734_v34 }
0x1276   :  { %v1709_v31 = vadd.f32 1.0, %v1707_v30  ;;  %v1735_v56 = vmul.f32 %v1733_v35, %v1705_v29  ;;  %v2320_v35 = vld [vmem:[%s2910_s15] sm:$0xff]  }
0x1278   :  { %2379 = vrcp.f32 %v1709_v31  ;;  %v1738_v46 = vmul.f32 1.442695, %v1735_v56 }
0x1279   :  { %2381 = vpow2.f32 %v1736_v40 }
0x127a   :  { %2383 = vpow2.f32 %v1738_v46  ;;  %v2044_v46 = vld [vmem:[%s2911_s13] ss:$0 sm:$0xff] }
0x1281   :  { %v2378_v36 = vpop.eup %2377 }
0x1282   :  { %v1714_v39 = vmul.f32 1.0614054, %v2378_v36 }
0x1284   :  { %v1716_v41 = vadd.f32 -1.4531521, %v1714_v39 }
0x1285   :  { %v2380_v0 = vpop.eup %2379 }
0x1286   :  { %v1718_v44 = vmul.f32 %v2378_v36, %v1716_v41  ;;  %v1715_v45 = vmul.f32 1.0614054, %v2380_v0  ;;  %v2382_v57 = vpop.eup %2381 }
0x1287   :  { %v2384_v61 = vpop.eup %2383 }
0x1288   :  { %v1720_v47 = vadd.f32 1.4214138, %v1718_v44  ;;  %v1717_v1 = vadd.f32 -1.4531521, %v1715_v45 }
0x128a   :  { %v1722_v48 = vmul.f32 %v2378_v36, %v1720_v47  ;;  %v1719_v49 = vmul.f32 %v2380_v0, %v1717_v1 }
0x128c   :  { %v1724_v11 = vadd.f32 -0.28449672, %v1722_v48  ;;  %v1721_v50 = vadd.f32 1.4214138, %v1719_v49 }
0x128e   :  { %v1726_v51 = vmul.f32 %v2378_v36, %v1724_v11  ;;  %v1723_v52 = vmul.f32 %v2380_v0, %v1721_v50 }
0x1290   :  { %v1728_v42 = vadd.f32 0.2548296, %v1726_v51  ;;  %v1725_v53 = vadd.f32 -0.28449672, %v1723_v52  ;;  %v2046_v52 = vld [vmem:[%s2913_s16] ss:$0 sm:$0xff] }
0x1292   :  { %v1730_v17 = vmul.f32 %v2378_v36, %v1728_v42  ;;  %v1727_v55 = vmul.f32 %v2380_v0, %v1725_v53 }
0x1294   :  { %v1740_v54 = vmul.f32 %v2382_v57, %v1730_v17  ;;  %v1729_v58 = vadd.f32 0.2548296, %v1727_v55 }
0x1296   :  { %v1742_v59 = vsub.f32 1.0, %v1740_v54  ;;  %v1731_v60 = vmul.f32 %v2380_v0, %v1729_v58 }
0x1298   :  { %v1746_v62 = vsub.f32 0.0, %v1742_v59  ;;  %v1741_v63 = vmul.f32 %v2384_v61, %v1731_v60 }
0x129a   :  { %v1748_v2 = vsel %vm1744_vm9, %v1746_v62, %v1742_v59  ;;  %v1743_v3 = vsub.f32 1.0, %v1741_v63 }
0x129b   :  { %v1750_v5 = vadd.f32 1.0, %v1748_v2 }
0x129c   :  { %v1747_v4 = vsub.f32 0.0, %v1743_v3 }
0x129d   :  { %v1752_v10 = vmul.f32 %v1750_v5, %v1700_v7 }
0x129e   :  { %v1749_v6 = vsel %vm1745_vm10, %v1747_v4, %v1743_v3 }
0x129f   :  { %v1751_v9 = vadd.f32 1.0, %v1749_v6 }
0x12a1   :  { %v1753_v12 = vmul.f32 %v1751_v9, %v1701_v8 }
0x12a3   :  { %v1754_v13 = vpack.c.bf16 %v1753_v12, %v1752_v10 }
0x12a5   :  { %2272 = vmatmul.mubr.msk.bf16.vlgmr.msra.gmra.mxu0 %vm903_vm8, %v1754_v13 }
0x1365   :  { %v1833_v16 = vpop.f32.mrf.mxu0 }
0x1366   :  { %v1834_v18 = vadd.f32 %v2038_v15, %v1833_v16 }
0x1367   :  { %v2273_v19 = vpop.f32.mrf.mxu0 }
0x1368   :  { %v1840_v20 = vadd.f32 %v1834_v18, %v2816_v43 }
0x1369   :  { %v1836_v32 = vpop.f32.mrf.mxu0 }
0x136a   :  { %v1837_v22 = vadd.f32 %v2038_v15, %v1836_v32  ;;  %v1844_v21 = vsel %vm66_vm0, %v1840_v20, 0.0 }
0x136b   :  { %1845 = vadd.xlane.f32.xlu0 %v1844_v21  ;;  %v2274_v23 = vpop.f32.mrf.mxu0 }
0x136c   :  { %v1841_v24 = vadd.f32 %v1837_v22, %v2821_v38  ;;  %v2319_v38 = vld [vmem:[%s2910_s15 + $0x8] sm:$0xff]  }
0x136d   :  { %2276 = vmatpush3.bf16.msra.mxu1 %v2319_v38 }
0x136e   :  { %v1847_v25 = vsel %vm66_vm0, %v1841_v24, 0.0  ;;  %2277 = vmatprep.subr.bf16.mxu1 %v2389_v14  ;;  %v2045_v14 = vld [vmem:[%s2912_s14] ss:$0 sm:$0xff] }
0x136f   :  { %1848 = vadd.xlane.f32.xlu1 %v1847_v25 }
0x1371   :  { %2278 = vmatpush3.bf16.msra.mxu1 %v2320_v35 }
0x13f4   :  { %v1846_v26 = vpop.xlane.xlu0 %1845 }
0x13f5   :  { %v1850_v37 = vmul.f32 0.03125, %v1846_v26 }
0x13f7   :  { %v1852_v27 = vsub.f32 %v1840_v20, %v1850_v37 }
0x13f8   :  { %v1849_v28 = vpop.xlane.xlu1 %1848 }
0x13f9   :  { %v1851_v29 = vmul.f32 0.03125, %v1849_v28  ;;  %v1854_v30 = vmul.f32 %v1852_v27, %v1852_v27 }
0x13fb   :  { %v1853_v31 = vsub.f32 %v1841_v24, %v1851_v29  ;;  %v1856_v43 = vsel %vm66_vm0, %v1854_v30, 0.0 }
0x13fc   :  { %1857 = vadd.xlane.f32.xlu0 %v1856_v43 }
0x13fd   :  { %v1855_v33 = vmul.f32 %v1853_v31, %v1853_v31 }
0x13ff   :  { %v1859_v34 = vsel %vm66_vm0, %v1855_v33, 0.0 }
0x1400   :  { %1860 = vadd.xlane.f32.xlu1 %v1859_v34 }
0x1485   :  { %v1858_v36 = vpop.xlane.xlu0 %1857 }
0x1486   :  { %v1862_v39 = vmul.f32 0.03125, %v1858_v36 }
0x1488   :  { %v1864_v40 = vadd.f32 1e-05, %v1862_v39 }
0x1489   :  { %v1861_v56 = vpop.xlane.xlu1 %1860 }
0x148a   :  { %2385 = vrsqrt.f32 %v1864_v40  ;;  %v1863_v41 = vmul.f32 0.03125, %v1861_v56 }
0x148c   :  { %v1865_v0 = vadd.f32 1e-05, %v1863_v41 }
0x148e   :  { %2387 = vrsqrt.f32 %v1865_v0 }
0x1497   :  { %v2386_v44 = vpop.eup %2385 }
0x1498   :  { %v1868_v45 = vmul.f32 %v2386_v44, %v1852_v27 }
0x149a   :  { %v1876_v48 = vmul.f32 %v2044_v46, %v1868_v45 }
0x149b   :  { %v2388_v47 = vpop.eup %2387 }
0x149c   :  { %v1869_v1 = vmul.f32 %v2388_v47, %v1853_v31  ;;  %v1884_v11 = vadd.f32 %v2045_v14, %v1876_v48 }
0x149e   :  { %v1877_v49 = vmul.f32 %v2044_v46, %v1869_v1 }
0x14a0   :  { %v1885_v50 = vadd.f32 %v2045_v14, %v1877_v49 }
0x14a2   :  { %v1886_v51 = vpack.c.bf16 %v1885_v50, %v1884_v11 }
0x14a4   :  { %2280 = vmatmul.mubr.msk.bf16.vlgmr.msra.gmra.mxu1 %vm66_vm0, %v1886_v51 }
0x1564   :  { %v1947_v42 = vpop.f32.mrf.mxu1 }
0x1565   :  { %v1948_v53 = vadd.f32 %v2046_v52, %v1947_v42 }
0x1566   :  { %v2281_v17 = vpop.f32.mrf.mxu1 }
0x1567   :  { %1954 = vst [vmem:[%s2914_s17] sm:$0xff] %v1948_v53 }
0x1568   :  { %v1950_v55 = vpop.f32.mrf.mxu1 }
0x1569   :  { %v1951_v57 = vadd.f32 %v2046_v52, %v1950_v55 }
0x156a   :  { %v2282_v54 = vpop.f32.mrf.mxu1 }
0x156b   :  { %1955 = vst [vmem:[%s2914_s17 + $0x8] sm:$0xff] %v1951_v57 }

</bundles_post_ra>
